<compile_context>
chip_gen: v7x
topology: tpu7x:2x2x1
jax: 0.10.0
libtpu: 0.0.40
codegen_flags: <defaults>
</compile_context>

<pallas_src>
import math
from functools import partial

import jax
import jax.numpy as jnp
import numpy as np
from jax.experimental import pallas as pl
from jax.experimental.pallas import tpu as pltpu


def _layernorm(x, gamma, beta, eps=1e-5):
    mu = jnp.mean(x, axis=-1, keepdims=True)
    var = jnp.mean((x - mu) ** 2, axis=-1, keepdims=True)   # biased var, like torch
    return (x - mu) * jax.lax.rsqrt(var + eps) * gamma + beta


def encoder_layer_kernel(nhead, hd, seq,
                         x_ref, wqkv_ref, bqkv_ref, wo_ref, bo_ref,
                         g1_ref, be1_ref, g2_ref, be2_ref,
                         w1_ref, b1_ref, w2_ref, b2_ref,
                         o_ref, xn2_ref, ctx_ref):
    """Grid = (batch_tiles, ffn_chunks).  Attention + residual run once per
    batch tile (f == 0); every f step adds one F-chunk of the FFN into the
    resident output block."""
    fi = pl.program_id(1)
    M, D = x_ref.shape            # M = block_b * seq (flattened batch*seq rows)
    bt = M // seq
    cdt = wqkv_ref.dtype          # bf16 compute dtype for MXU operands

    @pl.when(fi == 0)
    def _attention_and_init():
        x = x_ref[...]                                         # (M, D) f32
        xn = _layernorm(x, g1_ref[...], be1_ref[...])
        # Fused QKV projection (1/sqrt(hd) scale pre-folded into the Q columns).
        qkv = jnp.dot(xn.astype(cdt), wqkv_ref[...],
                      preferred_element_type=jnp.float32) + bqkv_ref[...]
        qkv = qkv.astype(cdt)                                  # single cast
        q = qkv[:, :D]
        k = qkv[:, D:2 * D]
        v = qkv[:, 2 * D:]

        # Per (batch element, head) softmax attention; contexts go straight
        # into the (M, D) bf16 context slab (no per-head output projection).
        for b in range(bt):                                    # static loops
            r0 = b * seq
            for h in range(nhead):
                c0 = h * hd
                qh = q[r0:r0 + seq, c0:c0 + hd]
                kh = k[r0:r0 + seq, c0:c0 + hd]
                vh = v[r0:r0 + seq, c0:c0 + hd]
                # scores: (S, S) = qh @ kh^T  (scale pre-folded into q)
                s = jax.lax.dot_general(qh, kh, (((1,), (1,)), ((), ())),
                                        preferred_element_type=jnp.float32)
                s = s - jnp.max(s, axis=-1, keepdims=True)
                e = jnp.exp(s)
                p = e * pl.reciprocal(jnp.sum(e, axis=-1, keepdims=True),
                                      approx=True)
                ctx = jnp.dot(p.astype(cdt), vh,
                              preferred_element_type=jnp.float32)   # (S, hd)
                ctx_ref[r0:r0 + seq, c0:c0 + hd] = ctx.astype(cdt)

        # Single output projection at full contraction depth D.
        attn = jnp.dot(ctx_ref[...], wo_ref[...],
                       preferred_element_type=jnp.float32) + bo_ref[...]
        x1 = x + attn                                          # residual 1
        xn2 = _layernorm(x1, g2_ref[...], be2_ref[...])
        # Initialize the resident output accumulator with residual + final FFN
        # bias; the FFN chunks below add the rest.
        o_ref[...] = x1 + b2_ref[...]
        xn2_ref[...] = xn2.astype(cdt)

    # --- one F-chunk of the feed-forward network (every grid step) ---
    hid = jnp.dot(xn2_ref[...], w1_ref[...],
                  preferred_element_type=jnp.float32) + b1_ref[...]
    hid = 0.5 * hid * (1.0 + jax.lax.erf(hid * (1.0 / math.sqrt(2.0))))  # exact GELU
    o_ref[...] += jnp.dot(hid.astype(cdt), w2_ref[...],
                          preferred_element_type=jnp.float32)


def transformer_encoder_layer(x, params, nhead, *, block_b=None, ff_chunk=None,
                              compute_dtype=jnp.bfloat16):
    B, S, D = x.shape
    F = params["w1"].shape[1]
    assert D % nhead == 0
    hd = D // nhead
    scale = 1.0 / math.sqrt(hd)
    f32 = jnp.float32
    cdt = compute_dtype

    # --- tiling choices ---
    if block_b is None:
        target_m = 256                          # fill v6e/v7x 256-wide MXU rows
        block_b = max(1, min(B, target_m // S if S <= target_m else 1))
        # Keep >= 2 batch tiles when possible so the "parallel" axis can shard
        # across v7x's two TensorCores.
        while block_b > 1 and (B // max(1, block_b)) < 2:
            block_b -= 1
    while B % block_b:
        block_b -= 1
    nbt = B // block_b
    M = block_b * S
    assert M % 8 == 0, "block_b * S must be a multiple of 8 (sublane tiling)"

    # --- parameter prep: fuse QKV, fold attention scale, cast weights bf16 ---
    wqkv = jnp.concatenate([params["wq"] * scale, params["wk"], params["wv"]],
                           axis=1).astype(cdt)                       # (D, 3D)
    bqkv = jnp.concatenate([params["bq"] * scale, params["bk"], params["bv"]],
                           axis=1).astype(f32)                       # (1, 3D)
    wo = params["wo"].astype(cdt)
    bo = params["bo"].astype(f32)
    g1, be1 = params["g1"].astype(f32), params["be1"].astype(f32)
    g2, be2 = params["g2"].astype(f32), params["be2"].astype(f32)
    w1 = params["w1"].astype(cdt)
    b1 = params["b1"].astype(f32)
    w2 = params["w2"].astype(cdt)
    b2 = params["b2"].astype(f32)

    # --- explicit VMEM budget from the chosen tiles ---
    def _nb(shape, dtype):
        return int(np.prod(shape)) * jnp.dtype(dtype).itemsize

    const_bytes = sum(_nb(a.shape, a.dtype) for a in (wqkv, bqkv, wo, bo,
                                                      g1, be1, g2, be2, b2))

    def _estimate(fc):
        return (2 * _nb((M, D), f32)                  # x block (double-buffered)
                + 2 * _nb((M, D), f32)                # resident output block
                + 2 * const_bytes                     # worst case double-buffered
                + 2 * (_nb((D, fc), cdt) + _nb((fc, D), cdt) + _nb((1, fc), f32))
                + 2 * _nb((M, D), cdt))               # xn2 + ctx scratch

    VMEM_CAP = 48 * 2**20     # leave headroom on v7x's 64 MiB physical VMEM

    if ff_chunk is None:
        # Prefer no chunking at all; otherwise chunk in multiples of 256
        # (MXU lane width on v6e/v7x), 128 only as a last resort.
        candidates = [F] + [c for c in (1024, 512, 256, 128)
                            if c < F and F % c == 0]
        ff_chunk = candidates[-1]
        for c in candidates:
            if _estimate(c) <= VMEM_CAP:
                ff_chunk = c
                break
    assert F % ff_chunk == 0
    nfc = F // ff_chunk

    est = _estimate(ff_chunk)
    vmem_limit = int(min(max(2 * est, 32 * 2**20), VMEM_CAP))

    # Lane-dense flattened activation slab (B*S, D); reshaped back at the end.
    x_flat = x.reshape(B * S, D)
    args = (x_flat, wqkv, bqkv, wo, bo, g1, be1, g2, be2, w1, b1, w2, b2)

    const = lambda shape: pl.BlockSpec(shape, lambda b, f: (0, 0))
    in_specs = [
        pl.BlockSpec((M, D), lambda b, f: (b, 0)),          # x (batch tile)
        const(wqkv.shape), const(bqkv.shape),
        const(wo.shape), const(bo.shape),
        const(g1.shape), const(be1.shape),
        const(g2.shape), const(be2.shape),
        pl.BlockSpec((D, ff_chunk), lambda b, f: (0, f)),   # w1 chunk
        pl.BlockSpec((1, ff_chunk), lambda b, f: (0, f)),   # b1 chunk
        pl.BlockSpec((ff_chunk, D), lambda b, f: (f, 0)),   # w2 chunk
        const(b2.shape),
    ]
    out_specs = pl.BlockSpec((M, D), lambda b, f: (b, 0))   # resident over f

    # NOTE: the FFN-chunk axis must stay last (innermost) and "arbitrary" so the
    # f == 0 attention phase runs before the chunks that read xn2_ref / o_ref.
    out = pl.pallas_call(
        partial(encoder_layer_kernel, nhead, hd, S),
        out_shape=jax.ShapeDtypeStruct((B * S, D), x.dtype),
        grid=(nbt, nfc),
        in_specs=in_specs,
        out_specs=out_specs,
        scratch_shapes=[pltpu.VMEM((M, D), cdt),            # xn2 cache
                        pltpu.VMEM((M, D), cdt)],           # per-head ctx slab
        compiler_params=pltpu.CompilerParams(
            dimension_semantics=("parallel", "arbitrary"),
            vmem_limit_bytes=vmem_limit),
    )(*args)
    return out.reshape(B, S, D)


def reference(x, p, nhead):
    """Pure-JAX f32 reference mirroring the PyTorch forward (eval mode, pre-norm)."""
    def ln(t, g, b):
        mu = t.mean(-1, keepdims=True)
        var = ((t - mu) ** 2).mean(-1, keepdims=True)
        return (t - mu) / jnp.sqrt(var + 1e-5) * g + b

    B, S, D = x.shape
    hd = D // nhead
    xn = ln(x, p["g1"], p["be1"])
    q = xn @ p["wq"] + p["bq"]
    k = xn @ p["wk"] + p["bk"]
    v = xn @ p["wv"] + p["bv"]
    q = q.reshape(B, S, nhead, hd).transpose(0, 2, 1, 3)
    k = k.reshape(B, S, nhead, hd).transpose(0, 2, 1, 3)
    v = v.reshape(B, S, nhead, hd).transpose(0, 2, 1, 3)
    s = jnp.einsum("bhqd,bhkd->bhqk", q, k) / math.sqrt(hd)
    pw = jax.nn.softmax(s, axis=-1)
    a = jnp.einsum("bhqk,bhkd->bhqd", pw, v).transpose(0, 2, 1, 3).reshape(B, S, D)
    a = a @ p["wo"] + p["bo"]
    x1 = x + a
    xn2 = ln(x1, p["g2"], p["be2"])
    h = xn2 @ p["w1"] + p["b1"]
    h = 0.5 * h * (1.0 + jax.lax.erf(h / math.sqrt(2.0)))
    return x1 + h @ p["w2"] + p["b2"]


def init_params(key, d_model, nhead, dim_feedforward):
    # Deterministic synthetic parameters (shapes from the module __init__).
    # Weights stored already transposed so the kernel computes x @ W.
    ks = jax.random.split(key, 12)
    sc = 0.05
    f32 = jnp.float32
    params = {
        "wq": sc * jax.random.normal(ks[0], (d_model, d_model), f32),
        "wk": sc * jax.random.normal(ks[1], (d_model, d_model), f32),
        "wv": sc * jax.random.normal(ks[2], (d_model, d_model), f32),
        "bq": sc * jax.random.normal(ks[3], (1, d_model), f32),
        "bk": sc * jax.random.normal(ks[4], (1, d_model), f32),
        "bv": sc * jax.random.normal(ks[5], (1, d_model), f32),
        "wo": sc * jax.random.normal(ks[6], (d_model, d_model), f32),
        "bo": sc * jax.random.normal(ks[7], (1, d_model), f32),
        "g1": jnp.ones((1, d_model), f32) + 0.1 * jax.random.normal(ks[8], (1, d_model), f32),
        "be1": 0.1 * jax.random.normal(ks[9], (1, d_model), f32),
        "g2": jnp.ones((1, d_model), f32) + 0.1 * jax.random.normal(ks[10], (1, d_model), f32),
        "be2": 0.1 * jax.random.normal(ks[11], (1, d_model), f32),
    }
    k2 = jax.random.split(jax.random.fold_in(key, 7), 4)
    params["w1"] = sc * jax.random.normal(k2[0], (d_model, dim_feedforward), f32)
    params["b1"] = sc * jax.random.normal(k2[1], (1, dim_feedforward), f32)
    params["w2"] = sc * jax.random.normal(k2[2], (dim_feedforward, d_model), f32)
    params["b2"] = sc * jax.random.normal(k2[3], (1, d_model), f32)
    return params


if __name__ == "__main__":
    # batch, seq, d_model, nhead, dim_feedforward (small but lane-dense: D=128)
    B, S, D, H, F = 4, 16, 128, 4, 256

    key = jax.random.PRNGKey(0)
    kx, kp = jax.random.split(key)
    x = jax.random.normal(kx, (B, S, D), jnp.float32)
    params = init_params(kp, D, H, F)

    # Heuristics pick block_b=2 (2 batch tiles -> megacore-friendly) and
    # ff_chunk=F=256 (no FFN chunking needed at these shapes): grid = (2, 1).
    out = transformer_encoder_layer(x, params, H)
    out = jax.block_until_ready(out)

    ref = reference(x, params, H)
    # Tolerance accounts for bf16 matmul operands + approx softmax reciprocal.
    np.testing.assert_allclose(np.asarray(out), np.asarray(ref), rtol=2e-2, atol=2e-2)

    print("KERNEL_OK")
</pallas_src>

<mosaic_0001>
module attributes {stable_mosaic.version = 11 : i64} {
  func.func @encoder_layer_kernel(%arg0: i32, %arg1: i32, %arg2: memref<32x128xf32, #tpu.memory_space<vmem>>, %arg3: memref<128x384xbf16, #tpu.memory_space<vmem>>, %arg4: memref<1x384xf32, #tpu.memory_space<vmem>>, %arg5: memref<128x128xbf16, #tpu.memory_space<vmem>>, %arg6: memref<1x128xf32, #tpu.memory_space<vmem>>, %arg7: memref<1x128xf32, #tpu.memory_space<vmem>>, %arg8: memref<1x128xf32, #tpu.memory_space<vmem>>, %arg9: memref<1x128xf32, #tpu.memory_space<vmem>>, %arg10: memref<1x128xf32, #tpu.memory_space<vmem>>, %arg11: memref<128x256xbf16, #tpu.memory_space<vmem>>, %arg12: memref<1x256xf32, #tpu.memory_space<vmem>>, %arg13: memref<256x128xbf16, #tpu.memory_space<vmem>>, %arg14: memref<1x128xf32, #tpu.memory_space<vmem>>, %arg15: memref<32x128xf32, #tpu.memory_space<vmem>>, %arg16: memref<32x128xbf16, #tpu.memory_space<vmem>>, %arg17: memref<32x128xbf16, #tpu.memory_space<vmem>>) attributes {dimension_semantics = [#tpu.dimension_semantics<parallel>, #tpu.dimension_semantics<arbitrary>], iteration_bounds = array<i64: 2, 1>, scalar_prefetch = 0 : i64, scratch_operands = 2 : i64, tpu.core_type = #tpu.core_type<tc>, window_params = [{transform_indices = @transform_0, window_bounds = array<i64: 32, 128>}, {pipeline_mode = #tpu.pipeline_mode<synchronous>, transform_indices = @transform_1, window_bounds = array<i64: 128, 384>}, {pipeline_mode = #tpu.pipeline_mode<synchronous>, transform_indices = @transform_2, window_bounds = array<i64: 1, 384>}, {pipeline_mode = #tpu.pipeline_mode<synchronous>, transform_indices = @transform_3, window_bounds = array<i64: 128, 128>}, {pipeline_mode = #tpu.pipeline_mode<synchronous>, transform_indices = @transform_4, window_bounds = array<i64: 1, 128>}, {pipeline_mode = #tpu.pipeline_mode<synchronous>, transform_indices = @transform_5, window_bounds = array<i64: 1, 128>}, {pipeline_mode = #tpu.pipeline_mode<synchronous>, transform_indices = @transform_6, window_bounds = array<i64: 1, 128>}, {pipeline_mode = #tpu.pipeline_mode<synchronous>, transform_indices = @transform_7, window_bounds = array<i64: 1, 128>}, {pipeline_mode = #tpu.pipeline_mode<synchronous>, transform_indices = @transform_8, window_bounds = array<i64: 1, 128>}, {transform_indices = @transform_9, window_bounds = array<i64: 128, 256>}, {transform_indices = @transform_10, window_bounds = array<i64: 1, 256>}, {transform_indices = @transform_11, window_bounds = array<i64: 256, 128>}, {pipeline_mode = #tpu.pipeline_mode<synchronous>, transform_indices = @transform_12, window_bounds = array<i64: 1, 128>}, {transform_indices = @transform_13, window_bounds = array<i64: 32, 128>}]} {
    %c0_i32 = arith.constant 0 : i32
    %0 = arith.cmpi eq, %arg1, %c0_i32 : i32
    %1 = arith.extui %0 : i1 to i32
    %c0_i32_0 = arith.constant 0 : i32
    %2 = arith.cmpi ne, %1, %c0_i32_0 : i32
    scf.if %2 {
      %c0_16 = arith.constant 0 : index
      %c0_17 = arith.constant 0 : index
      %23 = vector.load %arg2[%c0_16, %c0_17] : memref<32x128xf32, #tpu.memory_space<vmem>>, vector<32x128xf32>
      %c0_18 = arith.constant 0 : index
      %c0_19 = arith.constant 0 : index
      %24 = vector.load %arg7[%c0_18, %c0_19] : memref<1x128xf32, #tpu.memory_space<vmem>>, vector<1x128xf32>
      %c0_20 = arith.constant 0 : index
      %c0_21 = arith.constant 0 : index
      %25 = vector.load %arg8[%c0_20, %c0_21] : memref<1x128xf32, #tpu.memory_space<vmem>>, vector<1x128xf32>
      %cst_22 = arith.constant dense<0.000000e+00> : vector<32xf32>
      %26 = vector.multi_reduction <add>, %23, %cst_22 [1] : vector<32x128xf32> to vector<32xf32>
      %27 = vector.shape_cast %26 : vector<32xf32> to vector<32x1xf32>
      %cst_23 = arith.constant 1.280000e+02 : f32
      %28 = vector.broadcast %cst_23 : f32 to vector<32x1xf32>
      %29 = arith.divf %27, %28 : vector<32x1xf32>
      %30 = vector.broadcast %29 : vector<32x1xf32> to vector<32x128xf32>
      %31 = arith.subf %23, %30 : vector<32x128xf32>
      %32 = arith.mulf %31, %31 : vector<32x128xf32>
      %cst_24 = arith.constant dense<0.000000e+00> : vector<32xf32>
      %33 = vector.multi_reduction <add>, %32, %cst_24 [1] : vector<32x128xf32> to vector<32xf32>
      %34 = vector.shape_cast %33 : vector<32xf32> to vector<32x1xf32>
      %cst_25 = arith.constant 1.280000e+02 : f32
      %35 = vector.broadcast %cst_25 : f32 to vector<32x1xf32>
      %36 = arith.divf %34, %35 : vector<32x1xf32>
      %37 = vector.broadcast %29 : vector<32x1xf32> to vector<32x128xf32>
      %38 = arith.subf %23, %37 : vector<32x128xf32>
      %cst_26 = arith.constant 9.99999974E-6 : f32
      %39 = vector.broadcast %cst_26 : f32 to vector<32x1xf32>
      %40 = arith.addf %36, %39 : vector<32x1xf32>
      %41 = math.rsqrt %40 : vector<32x1xf32>
      %42 = vector.broadcast %41 : vector<32x1xf32> to vector<32x128xf32>
      %43 = arith.mulf %38, %42 : vector<32x128xf32>
      %44 = vector.broadcast %24 : vector<1x128xf32> to vector<32x128xf32>
      %45 = arith.mulf %43, %44 : vector<32x128xf32>
      %46 = vector.broadcast %25 : vector<1x128xf32> to vector<32x128xf32>
      %47 = arith.addf %45, %46 : vector<32x128xf32>
      %48 = arith.truncf %47 : vector<32x128xf32> to vector<32x128xbf16>
      %c0_27 = arith.constant 0 : index
      %c0_28 = arith.constant 0 : index
      %49 = vector.load %arg3[%c0_27, %c0_28] : memref<128x384xbf16, #tpu.memory_space<vmem>>, vector<128x384xbf16>
      %cst_29 = arith.constant dense<0.000000e+00> : vector<32x384xf32>
      %50 = tpu.matmul %48, %49, %cst_29 {dimension_numbers = #tpu.dot_dimension_numbers<[1], [0], [0], [1], [0, 0, 1, 1], [], []>} : vector<32x128xbf16>, vector<128x384xbf16>, vector<32x384xf32> -> vector<32x384xf32>
      %c0_30 = arith.constant 0 : index
      %c0_31 = arith.constant 0 : index
      %51 = vector.load %arg4[%c0_30, %c0_31] : memref<1x384xf32, #tpu.memory_space<vmem>>, vector<1x384xf32>
      %52 = vector.broadcast %51 : vector<1x384xf32> to vector<32x384xf32>
      %53 = arith.addf %50, %52 : vector<32x384xf32>
      %54 = arith.truncf %53 : vector<32x384xf32> to vector<32x384xbf16>
      %55 = vector.extract_strided_slice %54 {offsets = [0, 0], sizes = [32, 128], strides = [1, 1]} : vector<32x384xbf16> to vector<32x128xbf16>
      %56 = vector.extract_strided_slice %54 {offsets = [0, 128], sizes = [32, 128], strides = [1, 1]} : vector<32x384xbf16> to vector<32x128xbf16>
      %57 = vector.extract_strided_slice %54 {offsets = [0, 256], sizes = [32, 128], strides = [1, 1]} : vector<32x384xbf16> to vector<32x128xbf16>
      %58 = vector.extract_strided_slice %55 {offsets = [0, 0], sizes = [16, 32], strides = [1, 1]} : vector<32x128xbf16> to vector<16x32xbf16>
      %59 = vector.extract_strided_slice %56 {offsets = [0, 0], sizes = [16, 32], strides = [1, 1]} : vector<32x128xbf16> to vector<16x32xbf16>
      %60 = vector.extract_strided_slice %57 {offsets = [0, 0], sizes = [16, 32], strides = [1, 1]} : vector<32x128xbf16> to vector<16x32xbf16>
      %cst_32 = arith.constant dense<0.000000e+00> : vector<16x16xf32>
      %61 = tpu.matmul %58, %59, %cst_32 {dimension_numbers = #tpu.dot_dimension_numbers<[1], [1], [0], [0], [0, 0, 1, 0], [], []>} : vector<16x32xbf16>, vector<16x32xbf16>, vector<16x16xf32> -> vector<16x16xf32>
      %cst_33 = arith.constant dense<0xFF800000> : vector<16xf32>
      %62 = vector.multi_reduction <maximumf>, %61, %cst_33 [1] : vector<16x16xf32> to vector<16xf32>
      %63 = vector.shape_cast %62 : vector<16xf32> to vector<16x1xf32>
      %64 = vector.broadcast %63 : vector<16x1xf32> to vector<16x16xf32>
      %65 = arith.subf %61, %64 : vector<16x16xf32>
      %66 = math.exp %65 : vector<16x16xf32>
      %cst_34 = arith.constant dense<0.000000e+00> : vector<16xf32>
      %67 = vector.multi_reduction <add>, %66, %cst_34 [1] : vector<16x16xf32> to vector<16xf32>
      %68 = vector.shape_cast %67 : vector<16xf32> to vector<16x1xf32>
      %69 = tpu.reciprocal %68 {approx = true} : vector<16x1xf32> -> vector<16x1xf32>
      %70 = vector.broadcast %69 : vector<16x1xf32> to vector<16x16xf32>
      %71 = arith.mulf %66, %70 : vector<16x16xf32>
      %72 = arith.truncf %71 : vector<16x16xf32> to vector<16x16xbf16>
      %cst_35 = arith.constant dense<0.000000e+00> : vector<16x32xf32>
      %73 = tpu.matmul %72, %60, %cst_35 {dimension_numbers = #tpu.dot_dimension_numbers<[1], [0], [0], [1], [0, 0, 1, 1], [], []>} : vector<16x16xbf16>, vector<16x32xbf16>, vector<16x32xf32> -> vector<16x32xf32>
      %74 = arith.truncf %73 : vector<16x32xf32> to vector<16x32xbf16>
      %c0_36 = arith.constant 0 : index
      %c0_37 = arith.constant 0 : index
      %75 = vector.load %arg17[%c0_36, %c0_37] : memref<32x128xbf16, #tpu.memory_space<vmem>>, vector<16x32xbf16>
      tpu.vector_store %arg17[%c0_36, %c0_37], %74 {strides = array<i32>} : memref<32x128xbf16, #tpu.memory_space<vmem>>, vector<16x32xbf16>,
      %76 = vector.extract_strided_slice %55 {offsets = [0, 32], sizes = [16, 32], strides = [1, 1]} : vector<32x128xbf16> to vector<16x32xbf16>
      %77 = vector.extract_strided_slice %56 {offsets = [0, 32], sizes = [16, 32], strides = [1, 1]} : vector<32x128xbf16> to vector<16x32xbf16>
      %78 = vector.extract_strided_slice %57 {offsets = [0, 32], sizes = [16, 32], strides = [1, 1]} : vector<32x128xbf16> to vector<16x32xbf16>
      %cst_38 = arith.constant dense<0.000000e+00> : vector<16x16xf32>
      %79 = tpu.matmul %76, %77, %cst_38 {dimension_numbers = #tpu.dot_dimension_numbers<[1], [1], [0], [0], [0, 0, 1, 0], [], []>} : vector<16x32xbf16>, vector<16x32xbf16>, vector<16x16xf32> -> vector<16x16xf32>
      %cst_39 = arith.constant dense<0xFF800000> : vector<16xf32>
      %80 = vector.multi_reduction <maximumf>, %79, %cst_39 [1] : vector<16x16xf32> to vector<16xf32>
      %81 = vector.shape_cast %80 : vector<16xf32> to vector<16x1xf32>
      %82 = vector.broadcast %81 : vector<16x1xf32> to vector<16x16xf32>
      %83 = arith.subf %79, %82 : vector<16x16xf32>
      %84 = math.exp %83 : vector<16x16xf32>
      %cst_40 = arith.constant dense<0.000000e+00> : vector<16xf32>
      %85 = vector.multi_reduction <add>, %84, %cst_40 [1] : vector<16x16xf32> to vector<16xf32>
      %86 = vector.shape_cast %85 : vector<16xf32> to vector<16x1xf32>
      %87 = tpu.reciprocal %86 {approx = true} : vector<16x1xf32> -> vector<16x1xf32>
      %88 = vector.broadcast %87 : vector<16x1xf32> to vector<16x16xf32>
      %89 = arith.mulf %84, %88 : vector<16x16xf32>
      %90 = arith.truncf %89 : vector<16x16xf32> to vector<16x16xbf16>
      %cst_41 = arith.constant dense<0.000000e+00> : vector<16x32xf32>
      %91 = tpu.matmul %90, %78, %cst_41 {dimension_numbers = #tpu.dot_dimension_numbers<[1], [0], [0], [1], [0, 0, 1, 1], [], []>} : vector<16x16xbf16>, vector<16x32xbf16>, vector<16x32xf32> -> vector<16x32xf32>
      %92 = arith.truncf %91 : vector<16x32xf32> to vector<16x32xbf16>
      %c0_42 = arith.constant 0 : index
      %c32 = arith.constant 32 : index
      %93 = vector.load %arg17[%c0_42, %c32] : memref<32x128xbf16, #tpu.memory_space<vmem>>, vector<16x32xbf16>
      tpu.vector_store %arg17[%c0_42, %c32], %92 {strides = array<i32>} : memref<32x128xbf16, #tpu.memory_space<vmem>>, vector<16x32xbf16>,
      %94 = vector.extract_strided_slice %55 {offsets = [0, 64], sizes = [16, 32], strides = [1, 1]} : vector<32x128xbf16> to vector<16x32xbf16>
      %95 = vector.extract_strided_slice %56 {offsets = [0, 64], sizes = [16, 32], strides = [1, 1]} : vector<32x128xbf16> to vector<16x32xbf16>
      %96 = vector.extract_strided_slice %57 {offsets = [0, 64], sizes = [16, 32], strides = [1, 1]} : vector<32x128xbf16> to vector<16x32xbf16>
      %cst_43 = arith.constant dense<0.000000e+00> : vector<16x16xf32>
      %97 = tpu.matmul %94, %95, %cst_43 {dimension_numbers = #tpu.dot_dimension_numbers<[1], [1], [0], [0], [0, 0, 1, 0], [], []>} : vector<16x32xbf16>, vector<16x32xbf16>, vector<16x16xf32> -> vector<16x16xf32>
      %cst_44 = arith.constant dense<0xFF800000> : vector<16xf32>
      %98 = vector.multi_reduction <maximumf>, %97, %cst_44 [1] : vector<16x16xf32> to vector<16xf32>
      %99 = vector.shape_cast %98 : vector<16xf32> to vector<16x1xf32>
      %100 = vector.broadcast %99 : vector<16x1xf32> to vector<16x16xf32>
      %101 = arith.subf %97, %100 : vector<16x16xf32>
      %102 = math.exp %101 : vector<16x16xf32>
      %cst_45 = arith.constant dense<0.000000e+00> : vector<16xf32>
      %103 = vector.multi_reduction <add>, %102, %cst_45 [1] : vector<16x16xf32> to vector<16xf32>
      %104 = vector.shape_cast %103 : vector<16xf32> to vector<16x1xf32>
      %105 = tpu.reciprocal %104 {approx = true} : vector<16x1xf32> -> vector<16x1xf32>
      %106 = vector.broadcast %105 : vector<16x1xf32> to vector<16x16xf32>
      %107 = arith.mulf %102, %106 : vector<16x16xf32>
      %108 = arith.truncf %107 : vector<16x16xf32> to vector<16x16xbf16>
      %cst_46 = arith.constant dense<0.000000e+00> : vector<16x32xf32>
      %109 = tpu.matmul %108, %96, %cst_46 {dimension_numbers = #tpu.dot_dimension_numbers<[1], [0], [0], [1], [0, 0, 1, 1], [], []>} : vector<16x16xbf16>, vector<16x32xbf16>, vector<16x32xf32> -> vector<16x32xf32>
      %110 = arith.truncf %109 : vector<16x32xf32> to vector<16x32xbf16>
      %c0_47 = arith.constant 0 : index
      %c64 = arith.constant 64 : index
      %111 = vector.load %arg17[%c0_47, %c64] : memref<32x128xbf16, #tpu.memory_space<vmem>>, vector<16x32xbf16>
      tpu.vector_store %arg17[%c0_47, %c64], %110 {strides = array<i32>} : memref<32x128xbf16, #tpu.memory_space<vmem>>, vector<16x32xbf16>,
      %112 = vector.extract_strided_slice %55 {offsets = [0, 96], sizes = [16, 32], strides = [1, 1]} : vector<32x128xbf16> to vector<16x32xbf16>
      %113 = vector.extract_strided_slice %56 {offsets = [0, 96], sizes = [16, 32], strides = [1, 1]} : vector<32x128xbf16> to vector<16x32xbf16>
      %114 = vector.extract_strided_slice %57 {offsets = [0, 96], sizes = [16, 32], strides = [1, 1]} : vector<32x128xbf16> to vector<16x32xbf16>
      %cst_48 = arith.constant dense<0.000000e+00> : vector<16x16xf32>
      %115 = tpu.matmul %112, %113, %cst_48 {dimension_numbers = #tpu.dot_dimension_numbers<[1], [1], [0], [0], [0, 0, 1, 0], [], []>} : vector<16x32xbf16>, vector<16x32xbf16>, vector<16x16xf32> -> vector<16x16xf32>
      %cst_49 = arith.constant dense<0xFF800000> : vector<16xf32>
      %116 = vector.multi_reduction <maximumf>, %115, %cst_49 [1] : vector<16x16xf32> to vector<16xf32>
      %117 = vector.shape_cast %116 : vector<16xf32> to vector<16x1xf32>
      %118 = vector.broadcast %117 : vector<16x1xf32> to vector<16x16xf32>
      %119 = arith.subf %115, %118 : vector<16x16xf32>
      %120 = math.exp %119 : vector<16x16xf32>
      %cst_50 = arith.constant dense<0.000000e+00> : vector<16xf32>
      %121 = vector.multi_reduction <add>, %120, %cst_50 [1] : vector<16x16xf32> to vector<16xf32>
      %122 = vector.shape_cast %121 : vector<16xf32> to vector<16x1xf32>
      %123 = tpu.reciprocal %122 {approx = true} : vector<16x1xf32> -> vector<16x1xf32>
      %124 = vector.broadcast %123 : vector<16x1xf32> to vector<16x16xf32>
      %125 = arith.mulf %120, %124 : vector<16x16xf32>
      %126 = arith.truncf %125 : vector<16x16xf32> to vector<16x16xbf16>
      %cst_51 = arith.constant dense<0.000000e+00> : vector<16x32xf32>
      %127 = tpu.matmul %126, %114, %cst_51 {dimension_numbers = #tpu.dot_dimension_numbers<[1], [0], [0], [1], [0, 0, 1, 1], [], []>} : vector<16x16xbf16>, vector<16x32xbf16>, vector<16x32xf32> -> vector<16x32xf32>
      %128 = arith.truncf %127 : vector<16x32xf32> to vector<16x32xbf16>
      %c0_52 = arith.constant 0 : index
      %c96 = arith.constant 96 : index
      %129 = vector.load %arg17[%c0_52, %c96] : memref<32x128xbf16, #tpu.memory_space<vmem>>, vector<16x32xbf16>
      tpu.vector_store %arg17[%c0_52, %c96], %128 {strides = array<i32>} : memref<32x128xbf16, #tpu.memory_space<vmem>>, vector<16x32xbf16>,
      %130 = vector.extract_strided_slice %55 {offsets = [16, 0], sizes = [16, 32], strides = [1, 1]} : vector<32x128xbf16> to vector<16x32xbf16>
      %131 = vector.extract_strided_slice %56 {offsets = [16, 0], sizes = [16, 32], strides = [1, 1]} : vector<32x128xbf16> to vector<16x32xbf16>
      %132 = vector.extract_strided_slice %57 {offsets = [16, 0], sizes = [16, 32], strides = [1, 1]} : vector<32x128xbf16> to vector<16x32xbf16>
      %cst_53 = arith.constant dense<0.000000e+00> : vector<16x16xf32>
      %133 = tpu.matmul %130, %131, %cst_53 {dimension_numbers = #tpu.dot_dimension_numbers<[1], [1], [0], [0], [0, 0, 1, 0], [], []>} : vector<16x32xbf16>, vector<16x32xbf16>, vector<16x16xf32> -> vector<16x16xf32>
      %cst_54 = arith.constant dense<0xFF800000> : vector<16xf32>
      %134 = vector.multi_reduction <maximumf>, %133, %cst_54 [1] : vector<16x16xf32> to vector<16xf32>
      %135 = vector.shape_cast %134 : vector<16xf32> to vector<16x1xf32>
      %136 = vector.broadcast %135 : vector<16x1xf32> to vector<16x16xf32>
      %137 = arith.subf %133, %136 : vector<16x16xf32>
      %138 = math.exp %137 : vector<16x16xf32>
      %cst_55 = arith.constant dense<0.000000e+00> : vector<16xf32>
      %139 = vector.multi_reduction <add>, %138, %cst_55 [1] : vector<16x16xf32> to vector<16xf32>
      %140 = vector.shape_cast %139 : vector<16xf32> to vector<16x1xf32>
      %141 = tpu.reciprocal %140 {approx = true} : vector<16x1xf32> -> vector<16x1xf32>
      %142 = vector.broadcast %141 : vector<16x1xf32> to vector<16x16xf32>
      %143 = arith.mulf %138, %142 : vector<16x16xf32>
      %144 = arith.truncf %143 : vector<16x16xf32> to vector<16x16xbf16>
      %cst_56 = arith.constant dense<0.000000e+00> : vector<16x32xf32>
      %145 = tpu.matmul %144, %132, %cst_56 {dimension_numbers = #tpu.dot_dimension_numbers<[1], [0], [0], [1], [0, 0, 1, 1], [], []>} : vector<16x16xbf16>, vector<16x32xbf16>, vector<16x32xf32> -> vector<16x32xf32>
      %146 = arith.truncf %145 : vector<16x32xf32> to vector<16x32xbf16>
      %c16 = arith.constant 16 : index
      %c0_57 = arith.constant 0 : index
      %147 = vector.load %arg17[%c16, %c0_57] : memref<32x128xbf16, #tpu.memory_space<vmem>>, vector<16x32xbf16>
      tpu.vector_store %arg17[%c16, %c0_57], %146 {strides = array<i32>} : memref<32x128xbf16, #tpu.memory_space<vmem>>, vector<16x32xbf16>,
      %148 = vector.extract_strided_slice %55 {offsets = [16, 32], sizes = [16, 32], strides = [1, 1]} : vector<32x128xbf16> to vector<16x32xbf16>
      %149 = vector.extract_strided_slice %56 {offsets = [16, 32], sizes = [16, 32], strides = [1, 1]} : vector<32x128xbf16> to vector<16x32xbf16>
      %150 = vector.extract_strided_slice %57 {offsets = [16, 32], sizes = [16, 32], strides = [1, 1]} : vector<32x128xbf16> to vector<16x32xbf16>
      %cst_58 = arith.constant dense<0.000000e+00> : vector<16x16xf32>
      %151 = tpu.matmul %148, %149, %cst_58 {dimension_numbers = #tpu.dot_dimension_numbers<[1], [1], [0], [0], [0, 0, 1, 0], [], []>} : vector<16x32xbf16>, vector<16x32xbf16>, vector<16x16xf32> -> vector<16x16xf32>
      %cst_59 = arith.constant dense<0xFF800000> : vector<16xf32>
      %152 = vector.multi_reduction <maximumf>, %151, %cst_59 [1] : vector<16x16xf32> to vector<16xf32>
      %153 = vector.shape_cast %152 : vector<16xf32> to vector<16x1xf32>
      %154 = vector.broadcast %153 : vector<16x1xf32> to vector<16x16xf32>
      %155 = arith.subf %151, %154 : vector<16x16xf32>
      %156 = math.exp %155 : vector<16x16xf32>
      %cst_60 = arith.constant dense<0.000000e+00> : vector<16xf32>
      %157 = vector.multi_reduction <add>, %156, %cst_60 [1] : vector<16x16xf32> to vector<16xf32>
      %158 = vector.shape_cast %157 : vector<16xf32> to vector<16x1xf32>
      %159 = tpu.reciprocal %158 {approx = true} : vector<16x1xf32> -> vector<16x1xf32>
      %160 = vector.broadcast %159 : vector<16x1xf32> to vector<16x16xf32>
      %161 = arith.mulf %156, %160 : vector<16x16xf32>
      %162 = arith.truncf %161 : vector<16x16xf32> to vector<16x16xbf16>
      %cst_61 = arith.constant dense<0.000000e+00> : vector<16x32xf32>
      %163 = tpu.matmul %162, %150, %cst_61 {dimension_numbers = #tpu.dot_dimension_numbers<[1], [0], [0], [1], [0, 0, 1, 1], [], []>} : vector<16x16xbf16>, vector<16x32xbf16>, vector<16x32xf32> -> vector<16x32xf32>
      %164 = arith.truncf %163 : vector<16x32xf32> to vector<16x32xbf16>
      %c16_62 = arith.constant 16 : index
      %c32_63 = arith.constant 32 : index
      %165 = vector.load %arg17[%c16_62, %c32_63] : memref<32x128xbf16, #tpu.memory_space<vmem>>, vector<16x32xbf16>
      tpu.vector_store %arg17[%c16_62, %c32_63], %164 {strides = array<i32>} : memref<32x128xbf16, #tpu.memory_space<vmem>>, vector<16x32xbf16>,
      %166 = vector.extract_strided_slice %55 {offsets = [16, 64], sizes = [16, 32], strides = [1, 1]} : vector<32x128xbf16> to vector<16x32xbf16>
      %167 = vector.extract_strided_slice %56 {offsets = [16, 64], sizes = [16, 32], strides = [1, 1]} : vector<32x128xbf16> to vector<16x32xbf16>
      %168 = vector.extract_strided_slice %57 {offsets = [16, 64], sizes = [16, 32], strides = [1, 1]} : vector<32x128xbf16> to vector<16x32xbf16>
      %cst_64 = arith.constant dense<0.000000e+00> : vector<16x16xf32>
      %169 = tpu.matmul %166, %167, %cst_64 {dimension_numbers = #tpu.dot_dimension_numbers<[1], [1], [0], [0], [0, 0, 1, 0], [], []>} : vector<16x32xbf16>, vector<16x32xbf16>, vector<16x16xf32> -> vector<16x16xf32>
      %cst_65 = arith.constant dense<0xFF800000> : vector<16xf32>
      %170 = vector.multi_reduction <maximumf>, %169, %cst_65 [1] : vector<16x16xf32> to vector<16xf32>
      %171 = vector.shape_cast %170 : vector<16xf32> to vector<16x1xf32>
      %172 = vector.broadcast %171 : vector<16x1xf32> to vector<16x16xf32>
      %173 = arith.subf %169, %172 : vector<16x16xf32>
      %174 = math.exp %173 : vector<16x16xf32>
      %cst_66 = arith.constant dense<0.000000e+00> : vector<16xf32>
      %175 = vector.multi_reduction <add>, %174, %cst_66 [1] : vector<16x16xf32> to vector<16xf32>
      %176 = vector.shape_cast %175 : vector<16xf32> to vector<16x1xf32>
      %177 = tpu.reciprocal %176 {approx = true} : vector<16x1xf32> -> vector<16x1xf32>
      %178 = vector.broadcast %177 : vector<16x1xf32> to vector<16x16xf32>
      %179 = arith.mulf %174, %178 : vector<16x16xf32>
      %180 = arith.truncf %179 : vector<16x16xf32> to vector<16x16xbf16>
      %cst_67 = arith.constant dense<0.000000e+00> : vector<16x32xf32>
      %181 = tpu.matmul %180, %168, %cst_67 {dimension_numbers = #tpu.dot_dimension_numbers<[1], [0], [0], [1], [0, 0, 1, 1], [], []>} : vector<16x16xbf16>, vector<16x32xbf16>, vector<16x32xf32> -> vector<16x32xf32>
      %182 = arith.truncf %181 : vector<16x32xf32> to vector<16x32xbf16>
      %c16_68 = arith.constant 16 : index
      %c64_69 = arith.constant 64 : index
      %183 = vector.load %arg17[%c16_68, %c64_69] : memref<32x128xbf16, #tpu.memory_space<vmem>>, vector<16x32xbf16>
      tpu.vector_store %arg17[%c16_68, %c64_69], %182 {strides = array<i32>} : memref<32x128xbf16, #tpu.memory_space<vmem>>, vector<16x32xbf16>,
      %184 = vector.extract_strided_slice %55 {offsets = [16, 96], sizes = [16, 32], strides = [1, 1]} : vector<32x128xbf16> to vector<16x32xbf16>
      %185 = vector.extract_strided_slice %56 {offsets = [16, 96], sizes = [16, 32], strides = [1, 1]} : vector<32x128xbf16> to vector<16x32xbf16>
      %186 = vector.extract_strided_slice %57 {offsets = [16, 96], sizes = [16, 32], strides = [1, 1]} : vector<32x128xbf16> to vector<16x32xbf16>
      %cst_70 = arith.constant dense<0.000000e+00> : vector<16x16xf32>
      %187 = tpu.matmul %184, %185, %cst_70 {dimension_numbers = #tpu.dot_dimension_numbers<[1], [1], [0], [0], [0, 0, 1, 0], [], []>} : vector<16x32xbf16>, vector<16x32xbf16>, vector<16x16xf32> -> vector<16x16xf32>
      %cst_71 = arith.constant dense<0xFF800000> : vector<16xf32>
      %188 = vector.multi_reduction <maximumf>, %187, %cst_71 [1] : vector<16x16xf32> to vector<16xf32>
      %189 = vector.shape_cast %188 : vector<16xf32> to vector<16x1xf32>
      %190 = vector.broadcast %189 : vector<16x1xf32> to vector<16x16xf32>
      %191 = arith.subf %187, %190 : vector<16x16xf32>
      %192 = math.exp %191 : vector<16x16xf32>
      %cst_72 = arith.constant dense<0.000000e+00> : vector<16xf32>
      %193 = vector.multi_reduction <add>, %192, %cst_72 [1] : vector<16x16xf32> to vector<16xf32>
      %194 = vector.shape_cast %193 : vector<16xf32> to vector<16x1xf32>
      %195 = tpu.reciprocal %194 {approx = true} : vector<16x1xf32> -> vector<16x1xf32>
      %196 = vector.broadcast %195 : vector<16x1xf32> to vector<16x16xf32>
      %197 = arith.mulf %192, %196 : vector<16x16xf32>
      %198 = arith.truncf %197 : vector<16x16xf32> to vector<16x16xbf16>
      %cst_73 = arith.constant dense<0.000000e+00> : vector<16x32xf32>
      %199 = tpu.matmul %198, %186, %cst_73 {dimension_numbers = #tpu.dot_dimension_numbers<[1], [0], [0], [1], [0, 0, 1, 1], [], []>} : vector<16x16xbf16>, vector<16x32xbf16>, vector<16x32xf32> -> vector<16x32xf32>
      %200 = arith.truncf %199 : vector<16x32xf32> to vector<16x32xbf16>
      %c16_74 = arith.constant 16 : index
      %c96_75 = arith.constant 96 : index
      %201 = vector.load %arg17[%c16_74, %c96_75] : memref<32x128xbf16, #tpu.memory_space<vmem>>, vector<16x32xbf16>
      tpu.vector_store %arg17[%c16_74, %c96_75], %200 {strides = array<i32>} : memref<32x128xbf16, #tpu.memory_space<vmem>>, vector<16x32xbf16>,
      %c0_76 = arith.constant 0 : index
      %c0_77 = arith.constant 0 : index
      %202 = vector.load %arg17[%c0_76, %c0_77] : memref<32x128xbf16, #tpu.memory_space<vmem>>, vector<32x128xbf16>
      %c0_78 = arith.constant 0 : index
      %c0_79 = arith.constant 0 : index
      %203 = vector.load %arg5[%c0_78, %c0_79] : memref<128x128xbf16, #tpu.memory_space<vmem>>, vector<128x128xbf16>
      %cst_80 = arith.constant dense<0.000000e+00> : vector<32x128xf32>
      %204 = tpu.matmul %202, %203, %cst_80 {dimension_numbers = #tpu.dot_dimension_numbers<[1], [0], [0], [1], [0, 0, 1, 1], [], []>} : vector<32x128xbf16>, vector<128x128xbf16>, vector<32x128xf32> -> vector<32x128xf32>
      %c0_81 = arith.constant 0 : index
      %c0_82 = arith.constant 0 : index
      %205 = vector.load %arg6[%c0_81, %c0_82] : memref<1x128xf32, #tpu.memory_space<vmem>>, vector<1x128xf32>
      %206 = vector.broadcast %205 : vector<1x128xf32> to vector<32x128xf32>
      %207 = arith.addf %204, %206 : vector<32x128xf32>
      %208 = arith.addf %23, %207 : vector<32x128xf32>
      %c0_83 = arith.constant 0 : index
      %c0_84 = arith.constant 0 : index
      %209 = vector.load %arg9[%c0_83, %c0_84] : memref<1x128xf32, #tpu.memory_space<vmem>>, vector<1x128xf32>
      %c0_85 = arith.constant 0 : index
      %c0_86 = arith.constant 0 : index
      %210 = vector.load %arg10[%c0_85, %c0_86] : memref<1x128xf32, #tpu.memory_space<vmem>>, vector<1x128xf32>
      %cst_87 = arith.constant dense<0.000000e+00> : vector<32xf32>
      %211 = vector.multi_reduction <add>, %208, %cst_87 [1] : vector<32x128xf32> to vector<32xf32>
      %212 = vector.shape_cast %211 : vector<32xf32> to vector<32x1xf32>
      %cst_88 = arith.constant 1.280000e+02 : f32
      %213 = vector.broadcast %cst_88 : f32 to vector<32x1xf32>
      %214 = arith.divf %212, %213 : vector<32x1xf32>
      %215 = vector.broadcast %214 : vector<32x1xf32> to vector<32x128xf32>
      %216 = arith.subf %208, %215 : vector<32x128xf32>
      %217 = arith.mulf %216, %216 : vector<32x128xf32>
      %cst_89 = arith.constant dense<0.000000e+00> : vector<32xf32>
      %218 = vector.multi_reduction <add>, %217, %cst_89 [1] : vector<32x128xf32> to vector<32xf32>
      %219 = vector.shape_cast %218 : vector<32xf32> to vector<32x1xf32>
      %cst_90 = arith.constant 1.280000e+02 : f32
      %220 = vector.broadcast %cst_90 : f32 to vector<32x1xf32>
      %221 = arith.divf %219, %220 : vector<32x1xf32>
      %222 = vector.broadcast %214 : vector<32x1xf32> to vector<32x128xf32>
      %223 = arith.subf %208, %222 : vector<32x128xf32>
      %cst_91 = arith.constant 9.99999974E-6 : f32
      %224 = vector.broadcast %cst_91 : f32 to vector<32x1xf32>
      %225 = arith.addf %221, %224 : vector<32x1xf32>
      %226 = math.rsqrt %225 : vector<32x1xf32>
      %227 = vector.broadcast %226 : vector<32x1xf32> to vector<32x128xf32>
      %228 = arith.mulf %223, %227 : vector<32x128xf32>
      %229 = vector.broadcast %209 : vector<1x128xf32> to vector<32x128xf32>
      %230 = arith.mulf %228, %229 : vector<32x128xf32>
      %231 = vector.broadcast %210 : vector<1x128xf32> to vector<32x128xf32>
      %232 = arith.addf %230, %231 : vector<32x128xf32>
      %c0_92 = arith.constant 0 : index
      %c0_93 = arith.constant 0 : index
      %233 = vector.load %arg14[%c0_92, %c0_93] : memref<1x128xf32, #tpu.memory_space<vmem>>, vector<1x128xf32>
      %234 = vector.broadcast %233 : vector<1x128xf32> to vector<32x128xf32>
      %235 = arith.addf %208, %234 : vector<32x128xf32>
      %c0_94 = arith.constant 0 : index
      %c0_95 = arith.constant 0 : index
      %236 = vector.load %arg15[%c0_94, %c0_95] : memref<32x128xf32, #tpu.memory_space<vmem>>, vector<32x128xf32>
      tpu.vector_store %arg15[%c0_94, %c0_95], %235 {strides = array<i32>} : memref<32x128xf32, #tpu.memory_space<vmem>>, vector<32x128xf32>,
      %237 = arith.truncf %232 : vector<32x128xf32> to vector<32x128xbf16>
      %c0_96 = arith.constant 0 : index
      %c0_97 = arith.constant 0 : index
      %238 = vector.load %arg16[%c0_96, %c0_97] : memref<32x128xbf16, #tpu.memory_space<vmem>>, vector<32x128xbf16>
      tpu.vector_store %arg16[%c0_96, %c0_97], %237 {strides = array<i32>} : memref<32x128xbf16, #tpu.memory_space<vmem>>, vector<32x128xbf16>,
    } else {
    }
    %c0 = arith.constant 0 : index
    %c0_1 = arith.constant 0 : index
    %3 = vector.load %arg16[%c0, %c0_1] : memref<32x128xbf16, #tpu.memory_space<vmem>>, vector<32x128xbf16>
    %c0_2 = arith.constant 0 : index
    %c0_3 = arith.constant 0 : index
    %4 = vector.load %arg11[%c0_2, %c0_3] : memref<128x256xbf16, #tpu.memory_space<vmem>>, vector<128x256xbf16>
    %cst = arith.constant dense<0.000000e+00> : vector<32x256xf32>
    %5 = tpu.matmul %3, %4, %cst {dimension_numbers = #tpu.dot_dimension_numbers<[1], [0], [0], [1], [0, 0, 1, 1], [], []>} : vector<32x128xbf16>, vector<128x256xbf16>, vector<32x256xf32> -> vector<32x256xf32>
    %c0_4 = arith.constant 0 : index
    %c0_5 = arith.constant 0 : index
    %6 = vector.load %arg12[%c0_4, %c0_5] : memref<1x256xf32, #tpu.memory_space<vmem>>, vector<1x256xf32>
    %7 = vector.broadcast %6 : vector<1x256xf32> to vector<32x256xf32>
    %8 = arith.addf %5, %7 : vector<32x256xf32>
    %cst_6 = arith.constant 5.000000e-01 : f32
    %9 = vector.broadcast %cst_6 : f32 to vector<32x256xf32>
    %10 = arith.mulf %9, %8 : vector<32x256xf32>
    %cst_7 = arith.constant 0.707106769 : f32
    %11 = vector.broadcast %cst_7 : f32 to vector<32x256xf32>
    %12 = arith.mulf %8, %11 : vector<32x256xf32>
    %13 = math.erf %12 : vector<32x256xf32>
    %cst_8 = arith.constant 1.000000e+00 : f32
    %14 = vector.broadcast %cst_8 : f32 to vector<32x256xf32>
    %15 = arith.addf %14, %13 : vector<32x256xf32>
    %16 = arith.mulf %10, %15 : vector<32x256xf32>
    %c0_9 = arith.constant 0 : index
    %c0_10 = arith.constant 0 : index
    %17 = vector.load %arg15[%c0_9, %c0_10] : memref<32x128xf32, #tpu.memory_space<vmem>>, vector<32x128xf32>
    %18 = arith.truncf %16 : vector<32x256xf32> to vector<32x256xbf16>
    %c0_11 = arith.constant 0 : index
    %c0_12 = arith.constant 0 : index
    %19 = vector.load %arg13[%c0_11, %c0_12] : memref<256x128xbf16, #tpu.memory_space<vmem>>, vector<256x128xbf16>
    %cst_13 = arith.constant dense<0.000000e+00> : vector<32x128xf32>
    %20 = tpu.matmul %18, %19, %cst_13 {dimension_numbers = #tpu.dot_dimension_numbers<[1], [0], [0], [1], [0, 0, 1, 1], [], []>} : vector<32x256xbf16>, vector<256x128xbf16>, vector<32x128xf32> -> vector<32x128xf32>
    %21 = arith.addf %17, %20 : vector<32x128xf32>
    %c0_14 = arith.constant 0 : index
    %c0_15 = arith.constant 0 : index
    %22 = vector.load %arg15[%c0_14, %c0_15] : memref<32x128xf32, #tpu.memory_space<vmem>>, vector<32x128xf32>
    tpu.vector_store %arg15[%c0_14, %c0_15], %21 {strides = array<i32>} : memref<32x128xf32, #tpu.memory_space<vmem>>, vector<32x128xf32>,
    return
  }
  func.func @transform_0(%arg0: i32, %arg1: i32) -> (i32, i32) {
    %c0_i32 = arith.constant 0 : i32
    %c0_i32_0 = arith.constant 0 : i32
    return %arg0, %c0_i32 : i32, i32
  }
  func.func @transform_1(%arg0: i32, %arg1: i32) -> (i32, i32) {
    %c0_i32 = arith.constant 0 : i32
    %c0_i32_0 = arith.constant 0 : i32
    %c0_i32_1 = arith.constant 0 : i32
    return %c0_i32, %c0_i32_0 : i32, i32
  }
  func.func @transform_2(%arg0: i32, %arg1: i32) -> (i32, i32) {
    %c0_i32 = arith.constant 0 : i32
    %c0_i32_0 = arith.constant 0 : i32
    %c0_i32_1 = arith.constant 0 : i32
    return %c0_i32, %c0_i32_0 : i32, i32
  }
  func.func @transform_3(%arg0: i32, %arg1: i32) -> (i32, i32) {
    %c0_i32 = arith.constant 0 : i32
    %c0_i32_0 = arith.constant 0 : i32
    %c0_i32_1 = arith.constant 0 : i32
    return %c0_i32, %c0_i32_0 : i32, i32
  }
  func.func @transform_4(%arg0: i32, %arg1: i32) -> (i32, i32) {
    %c0_i32 = arith.constant 0 : i32
    %c0_i32_0 = arith.constant 0 : i32
    %c0_i32_1 = arith.constant 0 : i32
    return %c0_i32, %c0_i32_0 : i32, i32
  }
  func.func @transform_5(%arg0: i32, %arg1: i32) -> (i32, i32) {
    %c0_i32 = arith.constant 0 : i32
    %c0_i32_0 = arith.constant 0 : i32
    %c0_i32_1 = arith.constant 0 : i32
    return %c0_i32, %c0_i32_0 : i32, i32
  }
  func.func @transform_6(%arg0: i32, %arg1: i32) -> (i32, i32) {
    %c0_i32 = arith.constant 0 : i32
    %c0_i32_0 = arith.constant 0 : i32
    %c0_i32_1 = arith.constant 0 : i32
    return %c0_i32, %c0_i32_0 : i32, i32
  }
  func.func @transform_7(%arg0: i32, %arg1: i32) -> (i32, i32) {
    %c0_i32 = arith.constant 0 : i32
    %c0_i32_0 = arith.constant 0 : i32
    %c0_i32_1 = arith.constant 0 : i32
    return %c0_i32, %c0_i32_0 : i32, i32
  }
  func.func @transform_8(%arg0: i32, %arg1: i32) -> (i32, i32) {
    %c0_i32 = arith.constant 0 : i32
    %c0_i32_0 = arith.constant 0 : i32
    %c0_i32_1 = arith.constant 0 : i32
    return %c0_i32, %c0_i32_0 : i32, i32
  }
  func.func @transform_9(%arg0: i32, %arg1: i32) -> (i32, i32) {
    %c0_i32 = arith.constant 0 : i32
    %c0_i32_0 = arith.constant 0 : i32
    return %c0_i32, %arg1 : i32, i32
  }
  func.func @transform_10(%arg0: i32, %arg1: i32) -> (i32, i32) {
    %c0_i32 = arith.constant 0 : i32
    %c0_i32_0 = arith.constant 0 : i32
    return %c0_i32, %arg1 : i32, i32
  }
  func.func @transform_11(%arg0: i32, %arg1: i32) -> (i32, i32) {
    %c0_i32 = arith.constant 0 : i32
    %c0_i32_0 = arith.constant 0 : i32
    return %arg1, %c0_i32 : i32, i32
  }
  func.func @transform_12(%arg0: i32, %arg1: i32) -> (i32, i32) {
    %c0_i32 = arith.constant 0 : i32
    %c0_i32_0 = arith.constant 0 : i32
    %c0_i32_1 = arith.constant 0 : i32
    return %c0_i32, %c0_i32_0 : i32, i32
  }
  func.func @transform_13(%arg0: i32, %arg1: i32) -> (i32, i32) {
    %c0_i32 = arith.constant 0 : i32
    %c0_i32_0 = arith.constant 0 : i32
    return %arg0, %c0_i32 : i32, i32
  }
}

</mosaic_0001>

<bundles_post_ra>
// kernel: tpu_custom_call.1
= control target key start
LH: loop header
LB: loop body
LE: loop exit
PB: predicated region body
PF: predicated region fallthrough
CT: control target
= control target key end

     0   :  { %s4319_s0 = inlined_call_operand.hbm [shape: f32[64,128], index: 0, kind: input, shape index: {}]   ;;  %s4320_s1 = inlined_call_operand.hbm [shape: bf16[128,384], index: 1, kind: input, shape index: {}]   ;;  %s4321_s2 = inlined_call_operand.vmem [shape: f32[1,384], index: 2, kind: input, shape index: {}]   ;;  %s4322_s3 = inlined_call_operand.hbm [shape: bf16[128,128], index: 3, kind: input, shape index: {}]   ;;  %s4323_s4 = inlined_call_operand.vmem [shape: f32[1,128], index: 4, kind: input, shape index: {}]   ;;  %s4324_s5 = inlined_call_operand.vmem [shape: f32[1,128], index: 5, kind: input, shape index: {}]   ;;  %s4325_s6 = inlined_call_operand.vmem [shape: f32[1,128], index: 6, kind: input, shape index: {}]   ;;  %s4326_s7 = inlined_call_operand.vmem [shape: f32[1,128], index: 7, kind: input, shape index: {}]   ;;  %s4327_s8 = inlined_call_operand.vmem [shape: f32[1,128], index: 8, kind: input, shape index: {}]   ;;  %s4328_s9 = inlined_call_operand.hbm [shape: bf16[128,256], index: 9, kind: input, shape index: {}]   ;;  %s4329_s10 = inlined_call_operand.vmem [shape: f32[1,256], index: 10, kind: input, shape index: {}]   ;;  %s4330_s11 = inlined_call_operand.hbm [shape: bf16[256,128], index: 11, kind: input, shape index: {}]   ;;  %s4331_s12 = inlined_call_operand.vmem [shape: f32[1,128], index: 12, kind: input, shape index: {}]   ;;  %s4332_s13 = inlined_call_operand.hbm [shape: f32[64,128], index: 13, kind: output, shape index: {}]  }
   0x1   :  { %4342 = sst [smem:[#allocation21_spill]] %s4320_s1 }
   0x2   :  { %4343 = sst [smem:[#allocation22_spill]] %s4323_s4 }
   0x3   :  { %4344 = sst [smem:[#allocation23_spill]] %s4326_s7 }
   0x4   :  { %4345 = sst [smem:[#allocation24_spill]] %s4327_s8 }
   0x5   :  { %4346 = sst [smem:[#allocation25_spill]] %s4329_s10 }
   0x6   :  { %4347 = sst [smem:[#allocation26_spill]] %s4331_s12 }
   0x7   :  { %4348 = sst [smem:[#allocation27_spill]] %s4332_s13 }
   0x8   :  { %18 = vsyncpa [#allocation5], 0 }
   0x9   :  { %20 = vsyncpa [#allocation5 + $0x1], 0 }
   0xa   :  { %21 = vsyncpa [#allocation8], 0 }
   0xb   :  { %22 = vsyncpa [#allocation11], 0 }
   0xc   :  { %23 = vsyncpa [#allocation6], 0 }
   0xd   :  { %25 = vsyncpa [#allocation6 + $0x1], 0  ;;  %s3641_s25 = smov 0   ;;  %s3643_s26 = smov 0  }
   0xe   :  { %s3645_s27 = smov 0   ;;  %s3647_s28 = smov 0  }
   0xf   :  { %s3649_s29 = smov 0   ;;  %s3651_s30 = smov 0  }
  0x10 LB: > { %4349 = sst [smem:[#allocation18_spill]] %s3529_s25  ;;  %s2692_s14 = sadd.s32 4294967295, %s3549_s30   ;;  %s3549_s30 = sphi %s3651_s30, %s31_s30   ;;  %s3545_s29 = sphi %s3649_s29, %s4384_s29   ;;  %s3541_s28 = sphi %s3647_s28, %s4383_s28   ;;  %s3537_s27 = sphi %s3645_s27, %s4382_s27   ;;  %s3533_s26 = sphi %s3643_s26, %s4381_s26   ;;  %s3529_s25 = sphi %s3641_s25, %s4380_s25  }
  0x11   : > { %4350 = sst [smem:[#allocation19_spill]] %s3541_s28  ;;  %s2693_s15 = sadd.s32 4294967294, %s3549_s30  }
  0x12   : > { %p63_p0 = scmp.ne.s32.totalorder %s3533_s26, %s3529_s25  ;;  %p3675_p1 = scmp.eq.s32.totalorder %s2692_s14, 0 }
  0x13   : > { %p3679_p2 = scmp.eq.s32.totalorder %s2692_s14, 1  ;;  %p360_p3 = scmp.eq.s32.totalorder %s2693_s15, 1 }
  0x14   : > { %s4351_s16 = scalar_select %p3675_p1, 1, 0 }
  0x15   : > { %s4352_s17 = scalar_select %p3679_p2, 1, 0 }
  0x16   : > { %p3685_p4 = por %p3675_p1, %p63_p0  ;;  %p2694_p5 = scmp.ge.s32.totalorder %s3549_s30, 1 }
  0x17   : > { %p3690_p6 = por %p360_p3, %p63_p0  ;;  %p367_p7 = scmp.lt.s32.totalorder %s3549_s30, 3 }
  0x18   : > { %s4353_s18 = scalar_select %p3685_p4, 1, 0 }
  0x19   : > { %s4354_s19 = scalar_select %p3690_p6, 1, 0 }
  0x1a   : > { %p3695_p8 = pnand %p2694_p5, %p367_p7  ;;  %s3551_s21 = smov [#allocation7]  }
  0x1b   : > { %4355 = sst [smem:[#allocation20_spill]] %s4354_s19  ;;  %s379_s22 = sshll.u32 %s3551_s21, 4  ;;  %s3699_s22 = int_to_ptr.vmem [resolvable:$true] %s379_s22 }
  0x1c   : > { %s4356_s20 = scalar_select %p3695_p8, 1, 0 }
  0x1d   : > { %p3040_p9 = pneg %p3695_p8  ;;  %s3552_s24 = smov [#allocation10]  }
  0x1e   : > { %s426_s14 = sshll.u32 %s3552_s24, 4  ;;  %s4358_s1 = sld [smem:[#allocation21_spill]]  ;;  %s3710_s14 = int_to_ptr.vmem [resolvable:$true] %s426_s14 }
  0x1f   : > { %p3706_p11 = pnand %p3040_p9, %p3675_p1 }
  0x21   : > { %p3720_p13 = pneg %p3706_p11 }
  0x24   : > { %s3317_s25 = scalar_lea.hbm %s4358_s1, 3072 }
  0x25   : > { %p3318_p12 = scmp.ne.s32.totalorder %s4358_s1, %s3317_s25  ;;  %p3324_p5 = scmp.lt.u32.totalorder %s3317_s25, %s4358_s1 }
  0x27   : > { %p3320_p0 = pnand %p3720_p13, %p3318_p12 }
  0x29   : > { %p3321_p3 = pneg %p3320_p0 }
  0x2b   : > { %p3326_p7 = pnand %p3324_p5, %p3321_p3 }
  0x2d   : > { %3329 = shalt.err (!%p3326_p7)
}
  0x2e   : > { %s3330_s13 = scalar_lea.vmem %s3699_s22, 3072  ;;  %p3338_p1 = scmp.lt.s32.totalorder %s3699_s22, %s3699_s22 }
  0x2f   : > { %p3331_p9 = scmp.ne.s32.totalorder %s3699_s22, %s3330_s13  ;;  %p3339_p4 = scmp.lt.s32.totalorder %s3330_s13, %s3330_s13 }
  0x31   : > { %p3333_p10 = pnand %p3331_p9, %p3720_p13  ;;  %p3340_p12 = por %p3339_p4, %p3338_p1 }
  0x33   : > { %p3334_p6 = pneg %p3333_p10 }
  0x35   : > { %p3341_p0 = pnand %p3340_p12, %p3334_p6 }
  0x37   : > { %3344 = shalt.err (!%p3341_p0)
}
  0x38   : > { %s3553_s19 = smov 192   ;;  %s3554_s12 = smov 12  }
  0x39   : > { %3043 = dma.hbm_to_vmem [thread:$0]  (!%p3706_p11), %s4358_s1, 3072, %s3699_s22, [#allocation8], %s3553_s19, %s3553_s19, %s3554_s12  }
  0x3a   : > { %s3345_s10 = scalar_lea.hbm %s4328_s9, 2048 }
  0x3b   : > { %p3346_p1 = scmp.ne.s32.totalorder %s4328_s9, %s3345_s10  ;;  %p3352_p10 = scmp.lt.u32.totalorder %s3345_s10, %s4328_s9 }
  0x3d   : > { %p3348_p4 = pnand %p3346_p1, %p3720_p13 }
  0x3f   : > { %p3349_p6 = pneg %p3348_p4 }
  0x41   : > { %p3354_p3 = pnand %p3352_p10, %p3349_p6 }
  0x43   : > { %3357 = shalt.err (!%p3354_p3)
}
  0x44   : > { %s3358_s22 = scalar_lea.vmem %s3710_s14, 2048  ;;  %p3366_p12 = scmp.lt.s32.totalorder %s3710_s14, %s3710_s14 }
  0x45   : > { %p3359_p5 = scmp.ne.s32.totalorder %s3710_s14, %s3358_s22  ;;  %p3367_p0 = scmp.lt.s32.totalorder %s3358_s22, %s3358_s22 }
  0x47   : > { %p3361_p7 = pnand %p3359_p5, %p3720_p13  ;;  %p3368_p1 = por %p3367_p0, %p3366_p12 }
  0x49   : > { %p3362_p9 = pneg %p3361_p7 }
  0x4b   : > { %p3369_p4 = pnand %p3368_p1, %p3362_p9 }
  0x4d   : > { %3372 = shalt.err (!%p3369_p4)
}
  0x4e   : > { %s4340_s7 = smov 128   ;;  %s4341_s4 = smov 8  }
  0x4f   : > { %3049 = dma.hbm_to_vmem [thread:$0]  (!%p3706_p11), %s4328_s9, 2048, %s3710_s14, [#allocation11], %s4340_s7, %s4340_s7, %s4341_s4  }
  0x50   : > { %s3557_s19 = smov [#allocation9]   ;;  %s3373_s21 = scalar_lea.hbm %s4322_s3, 1024 }
  0x51   : > { %s395_s12 = sshll.u32 %s3557_s19, 4  ;;  %p3374_p6 = scmp.ne.s32.totalorder %s4322_s3, %s3373_s21  ;;  %s396_s12 = int_to_ptr.vmem [resolvable:$true] %s395_s12 }
  0x52   : > { %p3380_p5 = scmp.lt.u32.totalorder %s3373_s21, %s4322_s3 }
  0x53   : > { %p3376_p10 = pnand %p3374_p6, %p3720_p13 }
  0x55   : > { %p3377_p3 = pneg %p3376_p10 }
  0x57   : > { %p3382_p7 = pnand %p3380_p5, %p3377_p3 }
  0x59   : > { %3385 = shalt.err (!%p3382_p7)
}
  0x5a   : > { %s3386_s14 = scalar_lea.vmem %s396_s12, 1024  ;;  %p3394_p1 = scmp.lt.s32.totalorder %s396_s12, %s396_s12 }
  0x5b   : > { %p3387_p9 = scmp.ne.s32.totalorder %s396_s12, %s3386_s14  ;;  %p3395_p4 = scmp.lt.s32.totalorder %s3386_s14, %s3386_s14 }
  0x5d   : > { %p3389_p12 = pnand %p3387_p9, %p3720_p13  ;;  %p3396_p8 = por %p3395_p4, %p3394_p1 }
  0x5f   : > { %p3390_p0 = pneg %p3389_p12 }
  0x61   : > { %p3397_p2 = pnand %p3396_p8, %p3390_p0 }
  0x63   : > { %3400 = shalt.err (!%p3397_p2)
}
  0x64   : > { %s3558_s8 = smov 64   ;;  %s3559_s10 = smov 4  }
  0x65   : > { %3046 = dma.hbm_to_vmem [thread:$0]  (!%p3706_p11), %s4322_s3, 1024, %s396_s12, [#allocation8], %s3558_s8, %s3558_s8, %s3559_s10  }
  0x66   : > { %s3560_s25 = smov [#allocation12]   ;;  %s3401_s13 = scalar_lea.hbm %s4330_s11, 2048 }
  0x67   : > { %s450_s15 = sshll.u32 %s3560_s25, 4  ;;  %p3402_p2 = scmp.ne.s32.totalorder %s4330_s11, %s3401_s13  ;;  %s451_s15 = int_to_ptr.vmem [resolvable:$true] %s450_s15 }
  0x68   : > { %p3408_p10 = scmp.lt.u32.totalorder %s3401_s13, %s4330_s11 }
  0x69   : > { %p3404_p8 = pnand %p3402_p2, %p3720_p13 }
  0x6b   : > { %p3405_p6 = pneg %p3404_p8 }
  0x6d   : > { %p3410_p3 = pnand %p3408_p10, %p3405_p6 }
  0x6f   : > { %3413 = shalt.err (!%p3410_p3)
}
  0x70   : > { %s3414_s12 = scalar_lea.vmem %s451_s15, 2048  ;;  %p3422_p12 = scmp.lt.s32.totalorder %s451_s15, %s451_s15 }
  0x71   : > { %p3415_p5 = scmp.ne.s32.totalorder %s451_s15, %s3414_s12  ;;  %p3423_p0 = scmp.lt.s32.totalorder %s3414_s12, %s3414_s12 }
  0x73   : > { %p3417_p7 = pnand %p3415_p5, %p3720_p13  ;;  %p3424_p1 = por %p3423_p0, %p3422_p12 }
  0x75   : > { %p3418_p9 = pneg %p3417_p7 }
  0x77   : > { %p3425_p4 = pnand %p3424_p1, %p3418_p9 }
  0x79   : > { %3428 = shalt.err (!%p3425_p4)
}
  0x7a   : > { %3052 = dma.hbm_to_vmem [thread:$0]  (!%p3706_p11), %s4330_s11, 2048, %s451_s15, [#allocation11], %s3558_s8, %s3558_s8, %s3559_s10  }
  0x7b   : > { %s43_s28 = sadd.s32 1, %s3545_s29  ;;  %s50_s7 = sadd.s32 1, %s3537_s27 }
  0x7c   : > { %p45_p13 = scmp.ge.s32.totalorder %s43_s28, 2  ;;  %p57_p2 = scmp.ne.s32.totalorder %s3537_s27, %s3533_s26 }
  0x7d   : > { %p58_p8 = scmp.eq.s32.totalorder %s3549_s30, 0  ;;  %p3065_p6 = scmp.lt.s32.totalorder %s3549_s30, 2 }
  0x7e   : > { %s4386_s28 = smov (%p45_p13, %s43_s28), 0  ;;  %p4360_p3 = scmp.ne.s32.totalorder %s4352_s17, 0 }
  0x7f   : > { %p59_p10 = por %p58_p8, %p57_p2  ;;  %s47_s4 = ssub.s32 %s3545_s29, %s4386_s28 }
  0x80   : > { %p3813_p5 = por %p4360_p3, %p57_p2  ;;  %s467_s25 = sand.u32 1, %s3537_s27  }
  0x81   : > { %p48_p7 = scmp.eq.s32.totalorder %s47_s4, 0  ;;  %s2701_s8 = sshll.u32 %s467_s25, 5 }
  0x82   : > { %s2802_s10 = sshll.u32 %s3545_s29, 9  ;;  %s471_s17 = scalar_lea.vmem [#allocation4], %s2701_s8 }
  0x83   : > { %s3822_s15 = scalar_select %p48_p7, %s3537_s27, %s50_s7  }
  0x84   : > { %s3827_s13 = scalar_lea.hbm %s4319_s0, %s2802_s10  ;;  %s478_s22 = sshll.u32 %s471_s17, 4  ;;  %s3835_s22 = int_to_ptr.vmem [resolvable:$true] %s478_s22 }
  0x85   : > { %p3831_p11 = pnand %p3065_p6, %p59_p10  ;;  %s3837_s12 = scalar_lea.sflag [#allocation5], %s467_s25 }
  0x86   : > { %s3429_s1 = scalar_lea.hbm %s3827_s13, 512  ;;  %s3434_s4 = scalar_lea.hbm %s4319_s0, 1024 }
  0x87   : > { %p3430_p9 = scmp.ne.s32.totalorder %s3827_s13, %s3429_s1  ;;  %p3431_p12 = pneg %p3831_p11 }
  0x88   : > { %p3435_p4 = scmp.lt.u32.totalorder %s3827_s13, %s4319_s0  ;;  %p3436_p13 = scmp.lt.u32.totalorder %s3434_s4, %s3429_s1 }
  0x89   : > { %p3432_p0 = pnand %p3431_p12, %p3430_p9  ;;  %p3438_p8 = scmp.lt.u32.totalorder %s3429_s1, %s3827_s13 }
  0x8a   : > { %p3437_p2 = por %p3436_p13, %p3435_p4 }
  0x8b   : > { %p3433_p1 = pneg %p3432_p0 }
  0x8c   : > { %p3439_p6 = por %p3438_p8, %p3437_p2 }
  0x8e   : > { %p3440_p10 = pnand %p3439_p6, %p3433_p1 }
  0x90   : > { %3443 = shalt.err (!%p3440_p10)
}
  0x91   : > { %s3444_s25 = scalar_lea.vmem %s3835_s22, 512  ;;  %s3561_s21 = smov [#allocation4]  }
  0x92   : > { %p3445_p3 = scmp.ne.s32.totalorder %s3835_s22, %s3444_s25  ;;  %s3449_s24 = sshll.u32 %s3561_s21, 4  ;;  %s3450_s24 = int_to_ptr.vmem [resolvable:$false] %s3449_s24 }
  0x93   : > { %s3451_s17 = scalar_lea.vmem %s3450_s24, 1024  ;;  %p3452_p0 = scmp.lt.s32.totalorder %s3835_s22, %s3450_s24 }
  0x94   : > { %p3447_p7 = pnand %p3445_p3, %p3431_p12  ;;  %p3453_p4 = scmp.lt.s32.totalorder %s3451_s17, %s3444_s25 }
  0x96   : > { %p3448_p9 = pneg %p3447_p7  ;;  %p3454_p13 = por %p3453_p4, %p3452_p0 }
  0x98   : > { %p3455_p2 = pnand %p3454_p13, %p3448_p9 }
  0x9a   : > { %3458 = shalt.err (!%p3455_p2)
}
  0x9b   : > { %s4363_s1 = smov 8   ;;  %s4364_s19 = smov 128  }
  0x9c   : > { %3056 = dma.hbm_to_vmem [thread:$0]  (!%p3831_p11), %s3827_s13, 512, %s3835_s22, %s3837_s12, %s4364_s19, %s4364_s19, %s4363_s1  }
  0x9d   : > { %p4365_p12 = scmp.ne.s32.totalorder %s4356_s20, 0 }
  0x9e   : > { %s3871_s7 = sand.u32 (!%p4365_p12), 1, %s3533_s26   ;;  %p4366_p1 = scmp.ne.s32.totalorder (!%p4365_p12), %s4353_s18, 0 }
  0x9f   : > { %490 = sbr.rel (%p4365_p12) target bundleno = 2795 (0xaeb), region = 72  ;;  %s2705_s4 = sshll.u32 (!%p4365_p12), %s3871_s7, 5 }
  0xa0   : > { %s493_s8 = scalar_lea.sflag (!%p4365_p12), [#allocation5], %s3871_s7  ;;  %s3877_s14 = scalar_lea.vmem (!%p4365_p12), [#allocation4], %s2705_s4 }
  0xa6   : > { %3512 = dma.done.wait (%p4366_p1), %s493_s8, 512  }
  0xa7   : > { %3514 = vsyncadd (%p4366_p1), %s493_s8, 4294966784  ;;  %p4367_p11 = scmp.ne.s32.totalorder %s4351_s16, 0 }
  0xa9   : > { %3516 = dma.done.wait (%p4367_p11), [#allocation8], 4096  }
  0xaa   : > { %3518 = vsyncadd (%p4367_p11), [#allocation8], 4294963200 }
  0xab   : > { %3520 = dma.done.wait (%p4367_p11), [#allocation11], 4096  }
  0xac   : > { %3522 = vsyncadd (%p4367_p11), [#allocation11], 4294963200  ;;  %v573_v0 = vld [vmem:[%s3877_s14] sm:$0xff]  ;;  %v575_v1 = vld [vmem:[%s3877_s14 + $0x10] sm:$0xff]  ;;  %v3562_v39 = vmov 0   ;;  %vm3564_vm0 = vmmov 0  }
  0xad   : > { %v574_v2 = vld [vmem:[%s3877_s14 + $0x8] sm:$0xff]  ;;  %579 = vadd.xlane.f32.xlu0 %v573_v0  ;;  %583 = vadd.xlane.f32.xlu1 %v575_v1  ;;  %v576_v3 = vld [vmem:[%s3877_s14 + $0x18] sm:$0xff]  ;;  %v3137_v4 = vld [vmem:[#allocation7 + $0x4] ss:$12 sps:$4 sm:$0xff]   ;;  %vm931_vm1 = vcmask 261120   ;;  %s3565_s10 = smov 96  }
  0xae   : > { %v3139_v5 = vld [vmem:[#allocation7] ss:$12 sps:$4 sm:$0xff]   ;;  %v3140_v6 = vld [vmem:[#allocation7 + $0x1c] ss:$12 sps:$4 sm:$0xff]   ;;  %823 = vmatprep.subr.bf16.mxu0 %v3137_v4  ;;  %v3143_v24 = vld [vmem:[#allocation7 + $0x18] ss:$12 sps:$4 sm:$0xff]   ;;  %855 = vmatprep.mubr.bf16.mxu0 %v3562_v39 }
  0xaf   : > { %v3142_v7 = vld [vmem:[#allocation7 + $0x8] ss:$12 sps:$4 sm:$0xff]   ;;  %824 = vmatpush1.bf16.msra.mxu0 %v3139_v5  ;;  %v3146_v26 = vld [vmem:[#allocation7 + $0x20] ss:$12 sps:$4 sm:$0xff]   ;;  %v3147_v27 = vld [vmem:[#allocation7 + $0x30] ss:$12 sps:$4 sm:$0xff]  }
  0xb0   : > { %2884 = vmatprep.subr.bf16.mxu1 %v3142_v7  ;;  %825 = vmatprep.subr.bf16.mxu0 %v3140_v6  ;;  %v3144_v25 = vld [vmem:[#allocation7 + $0x34] ss:$12 sps:$4 sm:$0xff]   ;;  %v3148_v28 = vld [vmem:[#allocation7 + $0x4c] ss:$12 sps:$4 sm:$0xff]   ;;  %v3152_v31 = vld [vmem:[#allocation7 + $0x64] ss:$12 sps:$4 sm:$0xff]  }
  0xb1   : > { %581 = vadd.xlane.f32.xlu0 %v574_v2  ;;  %585 = vadd.xlane.f32.xlu1 %v576_v3  ;;  %v3150_v29 = vld [vmem:[#allocation7 + $0x38] ss:$12 sps:$4 sm:$0xff]   ;;  %v3151_v30 = vld [vmem:[#allocation7 + $0x48] ss:$12 sps:$4 sm:$0xff]   ;;  %v3154_v32 = vld [vmem:[#allocation7 + $0x50] ss:$12 sps:$4 sm:$0xff]  }
  0xb2   : > { %2885 = vmatpush3.bf16.msra.mxu1 %v3142_v7  ;;  %v3155_v33 = vld [vmem:[#allocation7 + $0x60] ss:$12 sps:$4 sm:$0xff]   ;;  %v3156_v34 = vld [vmem:[#allocation7 + $0x7c] ss:$12 sps:$4 sm:$0xff]   ;;  %v3159_v36 = vld [vmem:[#allocation7 + $0x78] ss:$12 sps:$4 sm:$0xff]  }
  0xb3   : > { %826 = vmatpush1.bf16.msra.mxu0 %v3143_v24  ;;  %2886 = vmatprep.subr.bf16.mxu1 %v3146_v26  ;;  %v3158_v35 = vld [vmem:[#allocation7 + $0x68] ss:$12 sps:$4 sm:$0xff]   ;;  %v3162_v38 = vld [vmem:[#allocation7 + $0x80] ss:$12 sps:$4 sm:$0xff]   ;;  %v3163_v40 = vld [vmem:[#allocation7 + $0x90] ss:$12 sps:$4 sm:$0xff]  }
  0xb4   : > { %827 = vmatprep.subr.bf16.mxu0 %v3144_v25  ;;  %v3160_v37 = vld [vmem:[#allocation7 + $0x94] ss:$12 sps:$4 sm:$0xff]   ;;  %v3164_v41 = vld [vmem:[#allocation7 + $0xac] ss:$12 sps:$4 sm:$0xff]   ;;  %v3168_v44 = vld [vmem:[#allocation7 + $0xb0] ss:$12 sps:$4 sm:$0xff]  }
  0xb5   : > { %v3166_v42 = vld [vmem:[#allocation7 + $0x98] ss:$12 sps:$4 sm:$0xff]   ;;  %v3167_v43 = vld [vmem:[#allocation7 + $0xa8] ss:$12 sps:$4 sm:$0xff]   ;;  %v2711_v59 = vld [vmem:[%s4324_s5] ss:$0 sm:$0xff] }
  0xb6   : > { %2887 = vmatpush3.bf16.msra.mxu1 %v3146_v26  ;;  %s3566_s25 = smov 64   ;;  %s3567_s21 = smov 32   ;;  %vm979_vm2 = vcmask 130048   ;;  %vm1178_vm3 = vcmask 523520   ;;  %vm1306_vm4 = vcmask 785920   ;;  %vm1434_vm5 = vcmask 1048320  }
  0xb7   : > { %828 = vmatpush1.bf16.msra.mxu0 %v3147_v27  ;;  %2888 = vmatprep.subr.bf16.mxu1 %v3150_v29  ;;  %s4368_s1 = sld [smem:[#allocation22_spill]]  ;;  %s4370_s20 = sld [smem:[#allocation24_spill]] }
  0xb8   : > { %829 = vmatprep.subr.bf16.mxu0 %v3148_v28  ;;  %s4371_s12 = sld [smem:[#allocation25_spill]]  ;;  %s4373_s24 = sld [smem:[#allocation19_spill]] }
  0xb9   : > { %s558_s17 = scalar_lea.vmem [#allocation13], %s2705_s4  ;;  %s2544_s18 = scalar_lea.sflag [#allocation6], %s3871_s7 }
  0xba   : > { %2889 = vmatpush3.bf16.msra.mxu1 %v3150_v29  ;;  %s2557_s19 = sshll.u32 %s558_s17, 4  ;;  %s3568_s13 = smov [#allocation13]   ;;  %s4270_s19 = int_to_ptr.vmem [resolvable:$true] %s2557_s19 }
  0xbb   : > { %830 = vmatpush1.bf16.msra.mxu0 %v3151_v30  ;;  %2890 = vmatprep.subr.bf16.mxu1 %v3154_v32  ;;  %s3463_s22 = sshll.u32 %s3568_s13, 4  ;;  %s3464_s22 = int_to_ptr.vmem [resolvable:$false] %s3463_s22 }
  0xbc   : > { %831 = vmatprep.subr.bf16.mxu0 %v3152_v31  ;;  %p3466_p3 = scmp.lt.s32.totalorder %s4270_s19, %s3464_s22 }
  0xbe   : > { %2891 = vmatpush3.bf16.msra.mxu1 %v3154_v32 }
  0xbf   : > { %832 = vmatpush1.bf16.msra.mxu0 %v3155_v33  ;;  %2892 = vmatprep.subr.bf16.mxu1 %v3158_v35 }
  0xc0   : > { %833 = vmatprep.subr.bf16.mxu0 %v3156_v34 }
  0xc2   : > { %2893 = vmatpush3.bf16.msra.mxu1 %v3158_v35 }
  0xc3   : > { %834 = vmatpush1.bf16.msra.mxu0 %v3159_v36  ;;  %2894 = vmatprep.subr.bf16.mxu1 %v3162_v38 }
  0xc4   : > { %835 = vmatprep.subr.bf16.mxu0 %v3160_v37 }
  0xc6   : > { %2895 = vmatpush3.bf16.msra.mxu1 %v3162_v38 }
  0xc7   : > { %836 = vmatpush1.bf16.msra.mxu0 %v3163_v40  ;;  %2896 = vmatprep.subr.bf16.mxu1 %v3166_v42 }
  0xc8   : > { %837 = vmatprep.subr.bf16.mxu0 %v3164_v41 }
  0xca   : > { %2897 = vmatpush3.bf16.msra.mxu1 %v3166_v42 }
  0xcb   : > { %838 = vmatpush1.bf16.msra.mxu0 %v3167_v43  ;;  %2898 = vmatprep.subr.bf16.mxu1 %v3168_v44 }
  0xce   : > { %2899 = vmatpush3.bf16.msra.mxu1 %v3168_v44 }
 0x13a   : > { %v580_v8 = vpop.xlane.xlu0 %579  ;;  %v584_v9 = vpop.xlane.xlu1 %583 }
 0x13b   : > { %v588_v10 = vmul.f32 0.0078125, %v580_v8  ;;  %v590_v11 = vmul.f32 0.0078125, %v584_v9 }
 0x13d   : > { %v3895_v12 = vsub.f32 %v573_v0, %v588_v10  ;;  %v3897_v13 = vsub.f32 %v575_v1, %v590_v11  ;;  %v2712_v0 = vld [vmem:[%s4325_s6] ss:$0 sm:$0xff] }
 0x13e   : > { %v582_v14 = vpop.xlane.xlu0 %581  ;;  %v586_v15 = vpop.xlane.xlu1 %585 }
 0x13f   : > { %v589_v16 = vmul.f32 0.0078125, %v582_v14  ;;  %v596_v17 = vmul.f32 %v3895_v12, %v3895_v12  ;;  %v591_v18 = vmul.f32 0.0078125, %v586_v15  ;;  %v598_v21 = vmul.f32 %v3897_v13, %v3897_v13 }
 0x140   : > { %v3563_v14 = vmov 0.0  }
 0x141   : > { %v3901_v19 = vsub.f32 %v574_v2, %v589_v16  ;;  %600 = vadd.xlane.f32.xlu0 %v596_v17  ;;  %v3903_v20 = vsub.f32 %v576_v3, %v591_v18  ;;  %2904 = vmatprep.subr.bf16.mxu0 %v3563_v14  ;;  %v678_v17 = vld [vmem:[%s4321_s2] sm:$0x7] }
 0x142   : > { %2916 = vmatprep.subr.bf16.mxu1 %v3563_v14 }
 0x143   : > { %v597_v22 = vmul.f32 %v3901_v19, %v3901_v19  ;;  %v599_v23 = vmul.f32 %v3903_v20, %v3903_v20 }
 0x145   : > { %604 = vadd.xlane.f32.xlu0 %v598_v21  ;;  %602 = vadd.xlane.f32.xlu1 %v597_v22 }
 0x149   : > { %606 = vadd.xlane.f32.xlu1 %v599_v23 }
 0x1ce   : > { %v601_v45 = vpop.xlane.xlu0 %600 }
 0x1cf   : > { %v608_v46 = vmul.f32 0.0078125, %v601_v45 }
 0x1d1   : > { %v612_v47 = vadd.f32 1e-05, %v608_v46 }
 0x1d2   : > { %v603_v48 = vpop.xlane.xlu1 %602  ;;  %v605_v49 = vpop.xlane.xlu0 %604 }
 0x1d3   : > { %3217 = vrsqrt.f32 %v612_v47  ;;  %v609_v50 = vmul.f32 0.0078125, %v603_v48  ;;  %v610_v51 = vmul.f32 0.0078125, %v605_v49 }
 0x1d5   : > { %v613_v52 = vadd.f32 1e-05, %v609_v50  ;;  %v614_v53 = vadd.f32 1e-05, %v610_v51 }
 0x1d6   : > { %v607_v54 = vpop.xlane.xlu1 %606 }
 0x1d7   : > { %3219 = vrsqrt.f32 %v613_v52  ;;  %v611_v55 = vmul.f32 0.0078125, %v607_v54 }
 0x1d8   : > { %3221 = vrsqrt.f32 %v614_v53 }
 0x1d9   : > { %v615_v56 = vadd.f32 1e-05, %v611_v55 }
 0x1db   : > { %3223 = vrsqrt.f32 %v615_v56 }
 0x1dd   : > { %v3218_v57 = vpop.eup %3217 }
 0x1de   : > { %v620_v58 = vmul.f32 %v3218_v57, %v3895_v12 }
 0x1e0   : > { %v630_v63 = vmul.f32 %v2711_v59, %v620_v58 }
 0x1e1   : > { %v3220_v60 = vpop.eup %3219 }
 0x1e2   : > { %v3222_v61 = vpop.eup %3221  ;;  %v621_v62 = vmul.f32 %v3220_v60, %v3901_v19  ;;  %v640_v4 = vadd.f32 %v2712_v0, %v630_v63 }
 0x1e3   : > { %v622_v1 = vmul.f32 %v3222_v61, %v3897_v13  ;;  %v680_v13 = vlaneseq }
 0x1e4   : > { %v631_v2 = vmul.f32 %v2711_v59, %v621_v62 }
 0x1e5   : > { %v3224_v3 = vpop.eup %3223  ;;  %v632_v7 = vmul.f32 %v2711_v59, %v622_v1  ;;  %v3929_v15 = vshrl.u32 %v680_v13, 7 }
 0x1e6   : > { %v641_v5 = vadd.f32 %v2712_v0, %v631_v2  ;;  %v623_v6 = vmul.f32 %v3224_v3, %v3903_v20 }
 0x1e7   : > { %v642_v10 = vadd.f32 %v2712_v0, %v632_v7  ;;  %v682_v16 = vsub.s32 0, %v3929_v15  ;;  %v686_v18 = vsub.s32 1, %v3929_v15  ;;  %v690_v19 = vsub.s32 2, %v3929_v15 }
 0x1e8   : > { %v644_v8 = vpack.c.bf16 %v641_v5, %v640_v4  ;;  %v633_v9 = vmul.f32 %v2711_v59, %v623_v6 }
 0x1e9   : > { %v683_v20 = vrot.slane %v678_v17, %v682_v16  ;;  %v687_v22 = vrot.slane %v678_v17, %v686_v18  ;;  %v691_v24 = vrot.slane %v678_v17, %v690_v19 }
 0x1ea   : > { %856 = vmatmul.mubr.bf16.vlgmr.msra.gmra.mrb[0].mxu0 %v644_v8  ;;  %2900 = vmatprep.mubr.bf16.mxu1 %v644_v8  ;;  %v643_v11 = vadd.f32 %v2712_v0, %v633_v9 }
 0x1eb   : > { %865 = vmatprep.mubr.bf16.mxu0 %v3562_v39 }
 0x1ec   : > { %v645_v12 = vpack.c.bf16 %v643_v11, %v642_v10 }
 0x1ee   : > { %2901 = vmatmul.mubr.bf16.vlgmr.msra.gmra.mrb[0].mxu1 %v645_v12 }
 0x1ef   : > { %2918 = vmatprep.mubr.msk.bf16.mxu1 %vm3564_vm0, %v3563_v14 }
 0x1f2   : > { %866 = vmatmul.mubr.bf16.gmra.mrb[4].mxu0 %v645_v12 }
 0x1f3   : > { %2906 = vmatprep.mubr.msk.bf16.mxu0 %vm3564_vm0, %v3563_v14 }
 0x2bd   : > { %v857_v21 = vpop.f32.mrb[0].mxu0 }
 0x2be   : > { %v859_v23 = vpop.f32.mrb[1].mxu0  ;;  %v858_v26 = vadd.f32 %v857_v21, %v683_v20 }
 0x2bf   : > { %v861_v25 = vpop.f32.mrb[2].mxu0  ;;  %v860_v29 = vadd.f32 %v859_v23, %v687_v22 }
 0x2c0   : > { %v862_v27 = vadd.f32 %v861_v25, %v683_v20  ;;  %v863_v28 = vpop.f32.mrb[3].mxu0 }
 0x2c1   : > { %v864_v30 = vadd.f32 %v863_v28, %v687_v22  ;;  %v2902_v31 = vpop.f32.mrb[0].mxu1 }
 0x2c2   : > { %v925_v32 = vpack.c.bf16 %v862_v27, %v858_v26  ;;  %v919_v33 = vadd.f32 %v2902_v31, %v691_v24  ;;  %v910_v34 = vpop.f32.mrb[1].mxu1 }
 0x2c3   : > { %v926_v35 = vpack.c.bf16 %v864_v30, %v860_v29  ;;  %v2903_v36 = vpop.f32.mrb[2].mxu1  ;;  %v911_v40 = vadd.f32 %v910_v34, %v691_v24 }
 0x2c4   : > { %v922_v37 = vadd.f32 %v2903_v36, %v691_v24  ;;  %1050 = vrot.lane.b32.xlu1 %v925_v32, %s3565_s10  ;;  %v913_v38 = vpop.f32.mrb[3].mxu1 }
 0x2c5   : > { %v914_v41 = vadd.f32 %v913_v38, %v691_v24  ;;  %1053 = vrot.lane.b32.xlu0 %v926_v35, %s3565_s10  ;;  %v867_v42 = vpop.f32.mrb[4].mxu0  ;;  %v936_v43 = vsel %vm931_vm1, %v926_v35, 0 }
 0x2c6   : > { %v3944_v44 = vpack.c.bf16 %v922_v37, %v919_v33  ;;  %v869_v45 = vpop.f32.mrb[5].mxu0  ;;  %2905 = vmatpush3.bf16.xpose.msra.mxu0 %v936_v43  ;;  %v868_v48 = vadd.f32 %v867_v42, %v683_v20 }
 0x2c7   : > { %v3946_v46 = vpack.c.bf16 %v914_v41, %v911_v40  ;;  %v871_v47 = vpop.f32.mrb[6].mxu0  ;;  %2910 = vmatprep.subr.bf16.mxu0 %v3563_v14  ;;  %v870_v51 = vadd.f32 %v869_v45, %v687_v22 }
 0x2c8   : > { %v872_v49 = vadd.f32 %v871_v47, %v683_v20  ;;  %1182 = vrot.lane.b32.xlu1 %v926_v35, %s3566_s25  ;;  %v873_v50 = vpop.f32.mrb[7].mxu0 }
 0x2c9   : > { %v874_v52 = vadd.f32 %v873_v50, %v687_v22  ;;  %1310 = vrot.lane.b32.xlu0 %v926_v35, %s3567_s21 }
 0x2ca   : > { %v928_v53 = vpack.c.bf16 %v872_v49, %v868_v48 }
 0x2cb   : > { %v929_v54 = vpack.c.bf16 %v874_v52, %v870_v51 }
 0x2cc   : > { %1180 = vrot.lane.b32.xlu1 %v925_v32, %s3566_s25 }
 0x2cd   : > { %2907 = vmatmul.mubr.msk.bf16.vlgmr.msra.gmra.mrb[8].mxu0 %vm931_vm1, %v925_v32  ;;  %1556 = vrot.lane.b32.xlu0 %v929_v54, %s3565_s10  ;;  %v1440_v0 = vsel %vm931_vm1, %v929_v54, 0 }
 0x2ce   : > { %2911 = vmatpush3.bf16.msra.mxu0 %v3946_v46  ;;  %2912 = vmatprep.mubr.msk.bf16.mxu0 %vm3564_vm0, %v3563_v14 }
 0x2cf   : > { %2922 = vmatprep.subr.bf16.mxu0 %v3563_v14 }
 0x2d0   : > { %1308 = vrot.lane.b32.xlu1 %v925_v32, %s3567_s21 }
 0x2d1   : > { %1684 = vrot.lane.b32.xlu0 %v929_v54, %s3566_s25 }
 0x2d4   : > { %1553 = vrot.lane.b32.xlu1 %v928_v53, %s3565_s10 }
 0x2d5   : > { %1811 = vrot.lane.b32.xlu0 %v929_v54, %s3567_s21 }
 0x2d8   : > { %1682 = vrot.lane.b32.xlu1 %v928_v53, %s3566_s25 }
 0x2dc   : > { %1809 = vrot.lane.b32.xlu1 %v928_v53, %s3567_s21 }
 0x336   : > { %v1051_v55 = vpop.permute.xlu1 %1050 }
 0x337   : > { %v1054_v56 = vpop.permute.xlu0 %1053 }
 0x338   : > { %v1059_v57 = vsel %vm931_vm1, %v1054_v56, 0 }
 0x339   : > { %2917 = vmatpush3.bf16.xpose.msra.mxu1 %v1059_v57 }
 0x33a   : > { %2928 = vmatprep.subr.bf16.mxu1 %v3563_v14  ;;  %v1183_v58 = vpop.permute.xlu1 %1182 }
 0x33b   : > { %v1188_v59 = vsel %vm931_vm1, %v1183_v58, 0  ;;  %v1311_v60 = vpop.permute.xlu0 %1310 }
 0x33c   : > { %v1316_v62 = vsel %vm931_vm1, %v1311_v60, 0 }
 0x33e   : > { %v1181_v61 = vpop.permute.xlu1 %1180 }
 0x33f   : > { %v1557_v1 = vpop.permute.xlu0 %1556 }
 0x340   : > { %2919 = vmatmul.mubr.msk.bf16.vlgmr.msra.gmra.mrb[4].mxu1 %vm931_vm1, %v1051_v55  ;;  %v1562_v2 = vsel %vm931_vm1, %v1557_v1, 0 }
 0x341   : > { %2929 = vmatpush3.bf16.xpose.msra.mxu1 %v1188_v59  ;;  %2930 = vmatprep.mubr.msk.bf16.mxu1 %vm3564_vm0, %v3563_v14 }
 0x342   : > { %2940 = vmatprep.subr.bf16.mxu1 %v3563_v14  ;;  %v1309_v63 = vpop.permute.xlu1 %1308 }
 0x343   : > { %v1685_v3 = vpop.permute.xlu0 %1684 }
 0x344   : > { %v1690_v5 = vsel %vm931_vm1, %v1685_v3, 0 }
 0x346   : > { %v1554_v4 = vpop.permute.xlu1 %1553 }
 0x347   : > { %v1812_v6 = vpop.permute.xlu0 %1811 }
 0x348   : > { %2931 = vmatmul.mubr.msk.bf16.vlgmr.msra.gmra.mrb[8].mxu1 %vm931_vm1, %v1181_v61  ;;  %v1817_v8 = vsel %vm931_vm1, %v1812_v6, 0 }
 0x349   : > { %2941 = vmatpush3.bf16.xpose.msra.mxu1 %v1316_v62  ;;  %2942 = vmatprep.mubr.msk.bf16.mxu1 %vm3564_vm0, %v3563_v14 }
 0x34a   : > { %2952 = vmatprep.subr.bf16.mxu1 %v3563_v14  ;;  %v1683_v7 = vpop.permute.xlu1 %1682 }
 0x34e   : > { %v1810_v9 = vpop.permute.xlu1 %1809 }
 0x350   : > { %2943 = vmatmul.mubr.msk.bf16.vlgmr.msra.gmra.mrb[12].mxu1 %vm931_vm1, %v1309_v63 }
 0x351   : > { %2953 = vmatpush3.bf16.xpose.msra.mxu1 %v1440_v0  ;;  %2954 = vmatprep.mubr.msk.bf16.mxu1 %vm3564_vm0, %v3563_v14 }
 0x352   : > { %2964 = vmatprep.subr.bf16.mxu1 %v3563_v14 }
 0x358   : > { %2955 = vmatmul.mubr.msk.bf16.vlgmr.msra.gmra.mrb[16].mxu1 %vm931_vm1, %v928_v53 }
 0x359   : > { %2965 = vmatpush3.bf16.xpose.msra.mxu1 %v1562_v2  ;;  %2966 = vmatprep.mubr.msk.bf16.mxu1 %vm3564_vm0, %v3563_v14 }
 0x35a   : > { %2976 = vmatprep.subr.bf16.mxu1 %v3563_v14 }
 0x360   : > { %2967 = vmatmul.mubr.msk.bf16.vlgmr.msra.gmra.mrb[20].mxu1 %vm931_vm1, %v1554_v4 }
 0x361   : > { %2977 = vmatpush3.bf16.xpose.msra.mxu1 %v1690_v5  ;;  %2978 = vmatprep.mubr.msk.bf16.mxu1 %vm3564_vm0, %v3563_v14 }
 0x362   : > { %2988 = vmatprep.subr.bf16.mxu1 %v3563_v14 }
 0x368   : > { %2979 = vmatmul.mubr.msk.bf16.vlgmr.msra.gmra.mrb[24].mxu1 %vm931_vm1, %v1683_v7 }
 0x369   : > { %2989 = vmatpush3.bf16.xpose.msra.mxu1 %v1817_v8  ;;  %2990 = vmatprep.mubr.msk.bf16.mxu1 %vm3564_vm0, %v3563_v14 }
 0x370   : > { %2991 = vmatmul.mubr.msk.bf16.vlgmr.msra.gmra.mrb[28].mxu1 %vm931_vm1, %v1810_v9 }
 0x3a0   : > { %v972_v10 = vpop.f32.mrb[8].mxu0 }
 0x3a1   : > { %v2908_v11 = vpop.f32.mrb[9].mxu0  ;;  %v980_v12 = vsel %vm979_vm2, %v972_v10, -inf }
 0x3a2   : > { %v975_v13 = vpop.f32.mrb[10].mxu0  ;;  %981 = vmax.xlane.f32.xlu0 %v980_v12 }
 0x3a3   : > { %v2909_v17 = vpop.f32.mrb[11].mxu0  ;;  %v983_v19 = vsel %vm979_vm2, %v975_v13, -inf }
 0x3a4   : > { %984 = vmax.xlane.f32.xlu1 %v983_v19 }
 0x413   : > { %v3998_v20 = vpop.f32.mrb[4].mxu1 }
 0x414   : > { %v2920_v21 = vpop.f32.mrb[5].mxu1  ;;  %v1102_v22 = vsel %vm979_vm2, %v3998_v20, -inf }
 0x415   : > { %1103 = vmax.xlane.f32.xlu0 %v1102_v22  ;;  %v4002_v23 = vpop.f32.mrb[6].mxu1 }
 0x416   : > { %v2921_v24 = vpop.f32.mrb[7].mxu1  ;;  %v1105_v25 = vsel %vm979_vm2, %v4002_v23, -inf }
 0x419   : > { %1106 = vmax.xlane.f32.xlu0 %v1105_v25 }
 0x41b   : > { %v4006_v26 = vpop.f32.mrb[8].mxu1 }
 0x41c   : > { %v2932_v27 = vpop.f32.mrb[9].mxu1  ;;  %v1231_v28 = vsel %vm979_vm2, %v4006_v26, -inf }
 0x41d   : > { %1232 = vmax.xlane.f32.xlu0 %v1231_v28  ;;  %v4010_v29 = vpop.f32.mrb[10].mxu1 }
 0x41e   : > { %v2933_v30 = vpop.f32.mrb[11].mxu1  ;;  %v1234_v31 = vsel %vm979_vm2, %v4010_v29, -inf }
 0x41f   : > { %1235 = vmax.xlane.f32.xlu1 %v1234_v31 }
 0x423   : > { %v4014_v32 = vpop.f32.mrb[12].mxu1 }
 0x424   : > { %v2944_v33 = vpop.f32.mrb[13].mxu1  ;;  %v1359_v34 = vsel %vm979_vm2, %v4014_v32, -inf }
 0x425   : > { %1360 = vmax.xlane.f32.xlu0 %v1359_v34  ;;  %v4018_v35 = vpop.f32.mrb[14].mxu1 }
 0x426   : > { %v2945_v36 = vpop.f32.mrb[15].mxu1  ;;  %v1362_v37 = vsel %vm979_vm2, %v4018_v35, -inf }
 0x427   : > { %1363 = vmax.xlane.f32.xlu1 %v1362_v37 }
 0x42b   : > { %v4022_v38 = vpop.f32.mrb[16].mxu1 }
 0x42c   : > { %v2956_v40 = vpop.f32.mrb[17].mxu1  ;;  %v1483_v41 = vsel %vm979_vm2, %v4022_v38, -inf }
 0x42d   : > { %1484 = vmax.xlane.f32.xlu0 %v1483_v41  ;;  %v4026_v42 = vpop.f32.mrb[18].mxu1 }
 0x42e   : > { %v2957_v43 = vpop.f32.mrb[19].mxu1  ;;  %v1486_v45 = vsel %vm979_vm2, %v4026_v42, -inf }
 0x42f   : > { %1487 = vmax.xlane.f32.xlu1 %v1486_v45  ;;  %v982_v47 = vpop.xlane.xlu0 %981 }
 0x430   : > { %v986_v48 = vsub.f32 %v972_v10, %v982_v47 }
 0x431   : > { %v985_v49 = vpop.xlane.xlu1 %984 }
 0x432   : > { %v988_v50 = vmul.f32 1.442695, %v986_v48  ;;  %v987_v51 = vsub.f32 %v975_v13, %v985_v49 }
 0x433   : > { %v4030_v52 = vpop.f32.mrb[20].mxu1 }
 0x434   : > { %3225 = vpow2.f32 %v988_v50  ;;  %v990_v53 = vmul.f32 1.442695, %v987_v51  ;;  %v2968_v54 = vpop.f32.mrb[21].mxu1  ;;  %v1605_v55 = vsel %vm979_vm2, %v4030_v52, -inf }
 0x435   : > { %1606 = vmax.xlane.f32.xlu0 %v1605_v55  ;;  %v4034_v56 = vpop.f32.mrb[22].mxu1 }
 0x436   : > { %3227 = vpow2.f32 %v990_v53  ;;  %v2969_v57 = vpop.f32.mrb[23].mxu1  ;;  %v1608_v58 = vsel %vm979_vm2, %v4034_v56, -inf }
 0x437   : > { %1609 = vmax.xlane.f32.xlu1 %v1608_v58 }
 0x43b   : > { %v4038_v59 = vpop.f32.mrb[24].mxu1 }
 0x43c   : > { %v2980_v60 = vpop.f32.mrb[25].mxu1  ;;  %v1733_v61 = vsel %vm979_vm2, %v4038_v59, -inf }
 0x43d   : > { %1734 = vmax.xlane.f32.xlu0 %v1733_v61  ;;  %v4042_v62 = vpop.f32.mrb[26].mxu1 }
 0x43e   : > { %v4044_v63 = vpop.eup %3225  ;;  %v2981_v0 = vpop.f32.mrb[27].mxu1  ;;  %v1736_v1 = vsel %vm979_vm2, %v4042_v62, -inf }
 0x43f   : > { %1737 = vmax.xlane.f32.xlu1 %v1736_v1  ;;  %v992_v2 = vsel %vm979_vm2, %v4044_v63, 0.0 }
 0x440   : > { %v4050_v3 = vpop.eup %3227 }
 0x441   : > { %993 = vadd.xlane.f32.xlu0 %v992_v2  ;;  %v995_v4 = vsel %vm979_vm2, %v4050_v3, 0.0 }
 0x443   : > { %996 = vadd.xlane.f32.xlu1 %v995_v4  ;;  %v4054_v5 = vpop.f32.mrb[28].mxu1 }
 0x444   : > { %v2992_v6 = vpop.f32.mrb[29].mxu1  ;;  %v1860_v7 = vsel %vm979_vm2, %v4054_v5, -inf }
 0x445   : > { %v4058_v8 = vpop.f32.mrb[30].mxu1  ;;  %1861 = vmax.xlane.f32.xlu0 %v1860_v7 }
 0x446   : > { %v2993_v9 = vpop.f32.mrb[31].mxu1  ;;  %v1863_v10 = vsel %vm979_vm2, %v4058_v8, -inf }
 0x447   : > { %1864 = vmax.xlane.f32.xlu1 %v1863_v10 }
 0x458   : > { %1254 = vrot.lane.b32.xlu1 %v3946_v46, %s3566_s25 }
 0x45b   : > { %1126 = vrot.lane.b32.xlu0 %v3946_v46, %s3565_s10 }
 0x4a2   : > { %v1104_v11 = vpop.xlane.xlu0 %1103 }
 0x4a3   : > { %v1108_v12 = vsub.f32 %v3998_v20, %v1104_v11 }
 0x4a5   : > { %v1110_v13 = vmul.f32 1.442695, %v1108_v12 }
 0x4a6   : > { %v1107_v17 = vpop.xlane.xlu0 %1106 }
 0x4a7   : > { %3229 = vpow2.f32 %v1110_v13  ;;  %v1109_v19 = vsub.f32 %v4002_v23, %v1107_v17 }
 0x4a9   : > { %v1112_v21 = vmul.f32 1.442695, %v1109_v19 }
 0x4aa   : > { %v1233_v22 = vpop.xlane.xlu0 %1232 }
 0x4ab   : > { %3231 = vpow2.f32 %v1112_v21  ;;  %v1237_v24 = vsub.f32 %v4006_v26, %v1233_v22 }
 0x4ac   : > { %v1236_v25 = vpop.xlane.xlu1 %1235 }
 0x4ad   : > { %v1239_v27 = vmul.f32 1.442695, %v1237_v24  ;;  %v1238_v28 = vsub.f32 %v4010_v29, %v1236_v25 }
 0x4af   : > { %3233 = vpow2.f32 %v1239_v27  ;;  %v1241_v30 = vmul.f32 1.442695, %v1238_v28 }
 0x4b1   : > { %v4070_v31 = vpop.eup %3229  ;;  %3235 = vpow2.f32 %v1241_v30 }
 0x4b2   : > { %v1361_v20 = vpop.xlane.xlu0 %1360  ;;  %v1114_v33 = vsel %vm979_vm2, %v4070_v31, 0.0 }
 0x4b3   : > { %v1365_v23 = vsub.f32 %v4014_v32, %v1361_v20  ;;  %1115 = vadd.xlane.f32.xlu0 %v1114_v33 }
 0x4b4   : > { %v1364_v34 = vpop.xlane.xlu1 %1363 }
 0x4b5   : > { %v4075_v36 = vpop.eup %3231  ;;  %v1367_v26 = vmul.f32 1.442695, %v1365_v23  ;;  %v1366_v37 = vsub.f32 %v4018_v35, %v1364_v34 }
 0x4b6   : > { %v1117_v29 = vsel %vm979_vm2, %v4075_v36, 0.0 }
 0x4b7   : > { %3237 = vpow2.f32 %v1367_v26  ;;  %v1369_v40 = vmul.f32 1.442695, %v1366_v37  ;;  %1118 = vadd.xlane.f32.xlu1 %v1117_v29 }
 0x4b9   : > { %v4080_v41 = vpop.eup %3233  ;;  %3239 = vpow2.f32 %v1369_v40 }
 0x4ba   : > { %v1485_v43 = vpop.xlane.xlu0 %1484  ;;  %v1243_v32 = vsel %vm979_vm2, %v4080_v41, 0.0 }
 0x4bb   : > { %v4084_v45 = vpop.eup %3235  ;;  %v1489_v47 = vsub.f32 %v4022_v38, %v1485_v43  ;;  %1244 = vadd.xlane.f32.xlu0 %v1243_v32 }
 0x4bc   : > { %v1488_v48 = vpop.xlane.xlu1 %1487  ;;  %v1246_v35 = vsel %vm979_vm2, %v4084_v45, 0.0 }
 0x4bd   : > { %v1491_v49 = vmul.f32 1.442695, %v1489_v47  ;;  %v1490_v50 = vsub.f32 %v4026_v42, %v1488_v48  ;;  %1247 = vadd.xlane.f32.xlu1 %v1246_v35 }
 0x4bf   : > { %3241 = vpow2.f32 %v1491_v49  ;;  %v1493_v51 = vmul.f32 1.442695, %v1490_v50 }
 0x4c1   : > { %v4090_v53 = vpop.eup %3237  ;;  %3243 = vpow2.f32 %v1493_v51 }
 0x4c2   : > { %v1607_v54 = vpop.xlane.xlu0 %1606  ;;  %v1371_v55 = vsel %vm979_vm2, %v4090_v53, 0.0 }
 0x4c3   : > { %v4094_v57 = vpop.eup %3239  ;;  %v1611_v38 = vsub.f32 %v4030_v52, %v1607_v54  ;;  %1372 = vadd.xlane.f32.xlu0 %v1371_v55 }
 0x4c4   : > { %v1610_v58 = vpop.xlane.xlu1 %1609  ;;  %v1374_v60 = vsel %vm979_vm2, %v4094_v57, 0.0 }
 0x4c5   : > { %v1613_v42 = vmul.f32 1.442695, %v1611_v38  ;;  %v1612_v61 = vsub.f32 %v4034_v56, %v1610_v58  ;;  %1375 = vadd.xlane.f32.xlu1 %v1374_v60 }
 0x4c7   : > { %3245 = vpow2.f32 %v1613_v42  ;;  %v1615_v0 = vmul.f32 1.442695, %v1612_v61 }
 0x4c9   : > { %v4100_v1 = vpop.eup %3241  ;;  %3247 = vpow2.f32 %v1615_v0 }
 0x4ca   : > { %v1735_v2 = vpop.xlane.xlu0 %1734  ;;  %v1495_v4 = vsel %vm979_vm2, %v4100_v1, 0.0 }
 0x4cb   : > { %v4104_v6 = vpop.eup %3243  ;;  %1496 = vadd.xlane.f32.xlu0 %v1495_v4  ;;  %v1739_v29 = vsub.f32 %v4038_v59, %v1735_v2 }
 0x4cc   : > { %v1738_v52 = vpop.xlane.xlu1 %1737  ;;  %v1498_v7 = vsel %vm979_vm2, %v4104_v6, 0.0 }
 0x4cd   : > { %v1740_v9 = vsub.f32 %v4042_v62, %v1738_v52  ;;  %1499 = vadd.xlane.f32.xlu1 %v1498_v7  ;;  %v1741_v40 = vmul.f32 1.442695, %v1739_v29 }
 0x4ce   : > { %v994_v56 = vpop.xlane.xlu0 %993 }
 0x4cf   : > { %v1743_v10 = vmul.f32 1.442695, %v1740_v9  ;;  %3249 = vrcp.f32 %v994_v56 }
 0x4d0   : > { %v997_v11 = vpop.xlane.xlu1 %996 }
 0x4d1   : > { %v4109_v12 = vpop.eup %3245  ;;  %3251 = vpow2.f32 %v1743_v10 }
 0x4d2   : > { %3253 = vrcp.f32 %v997_v11  ;;  %v1862_v13 = vpop.xlane.xlu0 %1861  ;;  %v1617_v17 = vsel %vm979_vm2, %v4109_v12, 0.0 }
 0x4d3   : > { %v4113_v19 = vpop.eup %3247  ;;  %v1866_v21 = vsub.f32 %v4054_v5, %v1862_v13  ;;  %1618 = vadd.xlane.f32.xlu1 %v1617_v17 }
 0x4d4   : > { %v1865_v22 = vpop.xlane.xlu1 %1864  ;;  %v1620_v25 = vsel %vm979_vm2, %v4113_v19, 0.0 }
 0x4d5   : > { %v1868_v62 = vmul.f32 1.442695, %v1866_v21  ;;  %v1867_v24 = vsub.f32 %v4058_v8, %v1865_v22 }
 0x4d6   : > { %v1127_v26 = vpop.permute.xlu0 %1126 }
 0x4d7   : > { %3255 = vpow2.f32 %v1868_v62  ;;  %v1870_v27 = vmul.f32 1.442695, %v1867_v24  ;;  %1621 = vadd.xlane.f32.xlu1 %v1620_v25 }
 0x4d8   : > { %v1255_v32 = vpop.permute.xlu1 %1254 }
 0x4d9   : > { %3257 = vpow2.f32 %v1870_v27  ;;  %v3250_v28 = vpop.eup %3249 }
 0x4da   : > { %v1000_v5 = vmul.f32 %v3250_v28, %v4044_v63  ;;  %3259 = vpow2.f32 %v1741_v40 }
 0x4db   : > { %v4119_v30 = vpop.eup %3251 }
 0x4dc   : > { %v3254_v20 = vpop.eup %3253  ;;  %v1748_v33 = vsel %vm979_vm2, %v4119_v30, 0.0 }
 0x4dd   : > { %v1001_v23 = vmul.f32 %v3254_v20, %v4050_v3  ;;  %1749 = vadd.xlane.f32.xlu1 %v1748_v33 }
 0x4df   : > { %v1002_v8 = vpack.c.bf16 %v1001_v23, %v1000_v5 }
 0x4e1   : > { %v4125_v34 = vpop.eup %3255  ;;  %2913 = vmatmul.mubr.msk.bf16.vlgmr.msra.gmra.mrb[12].mxu0 %vm979_vm2, %v1002_v8  ;;  %1382 = vrot.lane.b32.xlu0 %v3946_v46, %s3567_s21 }
 0x4e2   : > { %2923 = vmatpush3.bf16.msra.mxu0 %v1127_v26  ;;  %v1872_v37 = vsel %vm979_vm2, %v4125_v34, 0.0  ;;  %2924 = vmatprep.mubr.msk.bf16.mxu0 %vm3564_vm0, %v3563_v14 }
 0x4e3   : > { %v4134_v63 = vpop.eup %3257  ;;  %1873 = vadd.xlane.f32.xlu1 %v1872_v37  ;;  %2934 = vmatprep.subr.bf16.mxu0 %v3563_v14 }
 0x4e4   : > { %v1875_v3 = vsel %vm979_vm2, %v4134_v63, 0.0  ;;  %v4142_v46 = vpop.eup %3259 }
 0x4e5   : > { %v1745_v43 = vsel %vm979_vm2, %v4142_v46, 0.0 }
 0x4e7   : > { %1876 = vadd.xlane.f32.xlu1 %v1875_v3 }
 0x4f8   : > { %1629 = vrot.lane.b32.xlu1 %v3944_v44, %s3565_s10 }
 0x500   : > { %1746 = vadd.xlane.f32.xlu0 %v1745_v43 }
 0x516   : > { %1756 = vrot.lane.b32.xlu0 %v3944_v44, %s3566_s25 }
 0x51a   : > { %1883 = vrot.lane.b32.xlu0 %v3944_v44, %s3567_s21 }
 0x540   : > { %v1116_v47 = vpop.xlane.xlu0 %1115 }
 0x541   : > { %3261 = vrcp.f32 %v1116_v47 }
 0x544   : > { %v1119_v59 = vpop.xlane.xlu1 %1118 }
 0x545   : > { %3263 = vrcp.f32 %v1119_v59 }
 0x548   : > { %v1245_v48 = vpop.xlane.xlu0 %1244 }
 0x549   : > { %3265 = vrcp.f32 %v1245_v48 }
 0x54a   : > { %v1248_v35 = vpop.xlane.xlu1 %1247 }
 0x54b   : > { %3267 = vrcp.f32 %v1248_v35  ;;  %v3262_v49 = vpop.eup %3261 }
 0x54c   : > { %v1122_v51 = vmul.f32 %v3262_v49, %v4070_v31 }
 0x54f   : > { %v3264_v50 = vpop.eup %3263 }
 0x550   : > { %v1123_v54 = vmul.f32 %v3264_v50, %v4075_v36  ;;  %v1373_v55 = vpop.xlane.xlu0 %1372 }
 0x551   : > { %3269 = vrcp.f32 %v1373_v55 }
 0x552   : > { %v1376_v38 = vpop.xlane.xlu1 %1375  ;;  %v1124_v58 = vpack.c.bf16 %v1123_v54, %v1122_v51 }
 0x553   : > { %3271 = vrcp.f32 %v1376_v38  ;;  %v3266_v60 = vpop.eup %3265 }
 0x554   : > { %2925 = vmatmul.mubr.msk.bf16.vlgmr.msra.gmra.mrb[16].mxu0 %vm979_vm2, %v1124_v58  ;;  %v1251_v31 = vmul.f32 %v3266_v60, %v4080_v41 }
 0x555   : > { %v3268_v42 = vpop.eup %3267  ;;  %2935 = vmatpush3.bf16.msra.mxu0 %v1255_v32  ;;  %2936 = vmatprep.mubr.msk.bf16.mxu0 %vm3564_vm0, %v3563_v14 }
 0x556   : > { %v1252_v61 = vmul.f32 %v3268_v42, %v4084_v45  ;;  %2946 = vmatprep.subr.bf16.mxu0 %v3563_v14 }
 0x558   : > { %v1497_v36 = vpop.xlane.xlu0 %1496  ;;  %v1253_v2 = vpack.c.bf16 %v1252_v61, %v1251_v31 }
 0x559   : > { %3273 = vrcp.f32 %v1497_v36 }
 0x55a   : > { %v1500_v0 = vpop.xlane.xlu1 %1499 }
 0x55b   : > { %3275 = vrcp.f32 %v1500_v0  ;;  %v3270_v4 = vpop.eup %3269 }
 0x55c   : > { %2937 = vmatmul.mubr.msk.bf16.vlgmr.msra.gmra.mrb[20].mxu0 %vm979_vm2, %v1253_v2  ;;  %v1383_v52 = vpop.permute.xlu0 %1382  ;;  %v1379_v41 = vmul.f32 %v3270_v4, %v4090_v53  ;;  %v3169_v4 = vld [vmem:[#allocation9] sm:$0xff]  }
 0x55d   : > { %v3272_v7 = vpop.eup %3271  ;;  %2947 = vmatpush3.bf16.msra.mxu0 %v1383_v52  ;;  %2948 = vmatprep.mubr.msk.bf16.mxu0 %vm3564_vm0, %v3563_v14  ;;  %v3170_v52 = vld [vmem:[#allocation9 + $0x8] sm:$0xff]  }
 0x55e   : > { %v1380_v45 = vmul.f32 %v3272_v7, %v4094_v57  ;;  %2958 = vmatprep.subr.bf16.mxu0 %v3563_v14  ;;  %3000 = vmatprep.subr.bf16.mxu1 %v3169_v4  ;;  %v3171_v7 = vld [vmem:[#allocation9 + $0x10] sm:$0xff]  }
 0x55f   : > { %3001 = vmatpush3.bf16.msra.mxu1 %v3169_v4 }
 0x560   : > { %v1619_v9 = vpop.xlane.xlu1 %1618  ;;  %v1381_v56 = vpack.c.bf16 %v1380_v45, %v1379_v41  ;;  %3002 = vmatprep.subr.bf16.mxu1 %v3170_v52  ;;  %v3172_v41 = vld [vmem:[#allocation9 + $0x18] sm:$0xff]  }
 0x563   : > { %v3274_v10 = vpop.eup %3273  ;;  %3003 = vmatpush3.bf16.msra.mxu1 %v3170_v52 }
 0x564   : > { %2949 = vmatmul.mubr.msk.bf16.vlgmr.msra.gmra.mrb[24].mxu0 %vm979_vm2, %v1381_v56  ;;  %v1622_v17 = vpop.xlane.xlu1 %1621  ;;  %v1503_v57 = vmul.f32 %v3274_v10, %v4100_v1  ;;  %3004 = vmatprep.subr.bf16.mxu1 %v3171_v7 }
 0x565   : > { %v3276_v11 = vpop.eup %3275  ;;  %2959 = vmatpush3.bf16.msra.mxu0 %v3944_v44  ;;  %2960 = vmatprep.mubr.msk.bf16.mxu0 %vm3564_vm0, %v3563_v14  ;;  %3277 = vrcp.f32 %v1622_v17  ;;  %v3174_v17 = vld [vmem:[#allocation9 + $0x28] sm:$0xff]  }
 0x566   : > { %v1504_v13 = vmul.f32 %v3276_v11, %v4104_v6  ;;  %2970 = vmatprep.subr.bf16.mxu0 %v3563_v14  ;;  %3279 = vrcp.f32 %v1619_v9 }
 0x567   : > { %3005 = vmatpush3.bf16.msra.mxu1 %v3171_v7 }
 0x568   : > { %v1505_v53 = vpack.c.bf16 %v1504_v13, %v1503_v57  ;;  %3006 = vmatprep.subr.bf16.mxu1 %v3172_v41  ;;  %v3173_v13 = vld [vmem:[#allocation9 + $0x20] sm:$0xff]  }
 0x56a   : > { %v1750_v21 = vpop.xlane.xlu1 %1749 }
 0x56b   : > { %3281 = vrcp.f32 %v1750_v21  ;;  %3007 = vmatpush3.bf16.msra.mxu1 %v3172_v41  ;;  %v3176_v21 = vld [vmem:[#allocation9 + $0x38] sm:$0xff]  }
 0x56c   : > { %2961 = vmatmul.mubr.msk.bf16.vlgmr.msra.gmra.mrb[28].mxu0 %vm979_vm2, %v1505_v53  ;;  %3008 = vmatprep.subr.bf16.mxu1 %v3173_v13  ;;  %v3175_v53 = vld [vmem:[#allocation9 + $0x30] sm:$0xff]  }
 0x56d   : > { %2972 = vmatprep.mubr.msk.bf16.mxu0 %vm3564_vm0, %v3563_v14 }
 0x56f   : > { %v3278_v22 = vpop.eup %3277  ;;  %3009 = vmatpush3.bf16.msra.mxu1 %v3173_v13  ;;  %v3183_v13 = vld [vmem:[#allocation10 + $0x20] ss:$8 sps:$4 sm:$0xff]  }
 0x570   : > { %v1874_v44 = vpop.xlane.xlu1 %1873  ;;  %v3280_v24 = vpop.eup %3279  ;;  %v1626_v6 = vmul.f32 %v3278_v22, %v4113_v19  ;;  %3010 = vmatprep.subr.bf16.mxu1 %v3174_v17 }
 0x571   : > { %v1625_v25 = vmul.f32 %v3280_v24, %v4109_v12 }
 0x573   : > { %v1627_v1 = vpack.c.bf16 %v1626_v6, %v1625_v25  ;;  %3011 = vmatpush3.bf16.msra.mxu1 %v3174_v17  ;;  %v3188_v17 = vld [vmem:[#allocation10 + $0x34] ss:$8 sps:$4 sm:$0xff]  }
 0x574   : > { %v1877_v62 = vpop.xlane.xlu1 %1876  ;;  %3012 = vmatprep.subr.bf16.mxu1 %v3175_v53 }
 0x575   : > { %v3282_v12 = vpop.eup %3281 }
 0x576   : > { %v1754_v33 = vmul.f32 %v3282_v12, %v4119_v30 }
 0x577   : > { %3013 = vmatpush3.bf16.msra.mxu1 %v3175_v53  ;;  %v3191_v53 = vld [vmem:[#allocation10 + $0x44] ss:$8 sps:$4 sm:$0xff]  }
 0x578   : > { %v1630_v27 = vpop.permute.xlu1 %1629  ;;  %3014 = vmatprep.subr.bf16.mxu1 %v3176_v21 }
 0x579   : > { %2971 = vmatpush3.bf16.msra.mxu0 %v1630_v27 }
 0x57a   : > { %2982 = vmatprep.subr.bf16.mxu0 %v3563_v14 }
 0x57b   : > { %3015 = vmatpush3.bf16.msra.mxu1 %v3176_v21  ;;  %v3189_v21 = vld [vmem:[#allocation10 + $0x40] ss:$8 sps:$4 sm:$0xff]  }
 0x57c   : > { %2973 = vmatmul.mubr.msk.bf16.vlgmr.msra.gmra.mrb[32].mxu0 %vm979_vm2, %v1627_v1 }
 0x57d   : > { %2984 = vmatprep.mubr.msk.bf16.mxu0 %vm3564_vm0, %v3563_v14 }
 0x58d   : > { %v1747_v28 = vpop.xlane.xlu0 %1746 }
 0x58e   : > { %3283 = vrcp.f32 %v1747_v28 }
 0x58f   : > { %3285 = vrcp.f32 %v1877_v62 }
 0x590   : > { %3287 = vrcp.f32 %v1874_v44 }
 0x591   : > { %v1757_v20 = vpop.permute.xlu0 %1756 }
 0x592   : > { %2983 = vmatpush3.bf16.msra.mxu0 %v1757_v20 }
 0x593   : > { %2994 = vmatprep.subr.bf16.mxu0 %v3563_v14 }
 0x595   : > { %v1884_v26 = vpop.permute.xlu0 %1883 }
 0x598   : > { %v3284_v19 = vpop.eup %3283 }
 0x599   : > { %v1753_v5 = vmul.f32 %v3284_v19, %v4142_v46  ;;  %v3286_v8 = vpop.eup %3285 }
 0x59a   : > { %v3288_v37 = vpop.eup %3287  ;;  %v1881_v3 = vmul.f32 %v3286_v8, %v4134_v63 }
 0x59b   : > { %v1755_v23 = vpack.c.bf16 %v1754_v33, %v1753_v5  ;;  %v1880_v29 = vmul.f32 %v3288_v37, %v4125_v34  ;;  %v2753_v37 = vld [vmem:[%s4368_s1] ss:$0 sm:$0xff]  ;;  %s2803_s1 = sshll.u32 %s4373_s24, 9 }
 0x59d   : > { %2985 = vmatmul.mubr.msk.bf16.vlgmr.msra.gmra.mrb[36].mxu0 %vm979_vm2, %v1755_v23  ;;  %v1882_v40 = vpack.c.bf16 %v1881_v3, %v1880_v29 }
 0x59e   : > { %2995 = vmatpush3.bf16.msra.mxu0 %v1884_v26  ;;  %2996 = vmatprep.mubr.msk.bf16.mxu0 %vm3564_vm0, %v3563_v14 }
 0x5a5   : > { %2997 = vmatmul.mubr.msk.bf16.vlgmr.msra.gmra.mrb[40].mxu0 %vm979_vm2, %v1882_v40 }
 0x5a6   : > { %2289 = vmatprep.mubr.bf16.mxu0 %v3562_v39 }
 0x5b4   : > { %v1040_v30 = vpop.f32.mrb[12].mxu0 }
 0x5b5   : > { %v2914_v46 = vpop.f32.mrb[13].mxu0 }
 0x5b6   : > { %v1043_v43 = vpop.f32.mrb[14].mxu0 }
 0x5b7   : > { %v1047_v32 = vpack.c.bf16 %v1043_v43, %v1040_v30  ;;  %v2915_v47 = vpop.f32.mrb[15].mxu0 }
 0x5b9   : > { %1048 = vst.msk [vmem:[#allocation3] sm:$0xff] %vm931_vm1, %v1047_v32  ;;  %v3313_v32 = vld [vmem:[%s3877_s14] sm:$0xff] }
 0x627   : > { %v1166_v59 = vpop.f32.mrb[16].mxu0 }
 0x628   : > { %v2926_v48 = vpop.f32.mrb[17].mxu0 }
 0x629   : > { %v1169_v35 = vpop.f32.mrb[18].mxu0  ;;  %v3314_v48 = vld [vmem:[%s3877_s14 + $0x8] sm:$0xff] }
 0x62a   : > { %v1173_v14 = vpack.c.bf16 %v1169_v35, %v1166_v59  ;;  %v2927_v49 = vpop.f32.mrb[19].mxu0 }
 0x62c   : > { %1175 = vrot.lane.b32.xlu0 %v1173_v14, %s3567_s21  ;;  %v3315_v14 = vld [vmem:[%s3877_s14 + $0x10] sm:$0xff] }
 0x62f   : > { %v1294_v34 = vpop.f32.mrb[20].mxu0 }
 0x630   : > { %v2938_v63 = vpop.f32.mrb[21].mxu0 }
 0x631   : > { %v1297_v50 = vpop.f32.mrb[22].mxu0  ;;  %v3316_v63 = vld [vmem:[%s3877_s14 + $0x18] sm:$0xff]  ;;  %s4369_s14 = sld [smem:[#allocation23_spill]] }
 0x632   : > { %v1301_v51 = vpack.c.bf16 %v1297_v50, %v1294_v34  ;;  %v2939_v54 = vpop.f32.mrb[23].mxu0 }
 0x633   : > { %v3179_v54 = vld [vmem:[#allocation10 + $0x4] ss:$8 sps:$4 sm:$0xff]  }
 0x634   : > { %1303 = vrot.lane.b32.xlu1 %v1301_v51, %s3566_s25  ;;  %v3177_v51 = vld [vmem:[#allocation10] ss:$8 sps:$4 sm:$0xff]   ;;  %2257 = vmatprep.subr.bf16.mxu0 %v3179_v54 }
 0x635   : > { %2258 = vmatpush1.bf16.msra.mxu0 %v3177_v51 }
 0x637   : > { %v1422_v55 = vpop.f32.mrb[24].mxu0 }
 0x638   : > { %v2950_v38 = vpop.f32.mrb[25].mxu0 }
 0x639   : > { %v1425_v58 = vpop.f32.mrb[26].mxu0  ;;  %v3180_v38 = vld [vmem:[#allocation10 + $0x10] ss:$8 sps:$4 sm:$0xff]  }
 0x63a   : > { %v1429_v60 = vpack.c.bf16 %v1425_v58, %v1422_v55  ;;  %v2951_v42 = vpop.f32.mrb[27].mxu0  ;;  %v3182_v55 = vld [vmem:[#allocation10 + $0x14] ss:$8 sps:$4 sm:$0xff]  }
 0x63b   : > { %2259 = vmatprep.subr.bf16.mxu0 %v3182_v55 }
 0x63c   : > { %1431 = vrot.lane.b32.xlu1 %v1429_v60, %s3565_s10  ;;  %2260 = vmatpush1.bf16.msra.mxu0 %v3180_v38 }
 0x63f   : > { %v1543_v61 = vpop.f32.mrb[28].mxu0 }
 0x640   : > { %v2962_v31 = vpop.f32.mrb[29].mxu0 }
 0x641   : > { %v1546_v36 = vpop.f32.mrb[30].mxu0 }
 0x642   : > { %v1550_v0 = vpack.c.bf16 %v1546_v36, %v1543_v61  ;;  %v2963_v2 = vpop.f32.mrb[31].mxu0 }
 0x644   : > { %1551 = vst.msk [vmem:[#allocation3 + $0x8] sm:$0xff] %vm931_vm1, %v1550_v0 }
 0x64f   : > { %v1669_v45 = vpop.f32.mrb[32].mxu0 }
 0x650   : > { %v2974_v9 = vpop.f32.mrb[33].mxu0 }
 0x651   : > { %v1672_v56 = vpop.f32.mrb[34].mxu0 }
 0x652   : > { %v1676_v10 = vpack.c.bf16 %v1672_v56, %v1669_v45  ;;  %v2975_v11 = vpop.f32.mrb[35].mxu0 }
 0x653   : > { %v3185_v11 = vld [vmem:[#allocation10 + $0x24] ss:$8 sps:$4 sm:$0xff]  }
 0x654   : > { %1678 = vrot.lane.b32.xlu0 %v1676_v10, %s3567_s21  ;;  %2261 = vmatprep.subr.bf16.mxu0 %v3185_v11  ;;  %v3214_v11 = vld [vmem:[#allocation12 + $0x30] sm:$0xff]   ;;  %s4372_s21 = sld [smem:[#allocation26_spill]] }
 0x655   : > { %2262 = vmatpush1.bf16.msra.mxu0 %v3183_v13  ;;  %v3215_v13 = vld [vmem:[#allocation12 + $0x78] sm:$0xff]  }
 0x656   : > { %2263 = vmatprep.subr.bf16.mxu0 %v3188_v17  ;;  %v3216_v17 = vld [vmem:[#allocation12 + $0x38] sm:$0xff]  }
 0x670   : > { %v1796_v57 = vpop.f32.mrb[36].mxu0 }
 0x671   : > { %v2986_v44 = vpop.f32.mrb[37].mxu0 }
 0x672   : > { %v1799_v22 = vpop.f32.mrb[38].mxu0  ;;  %v3194_v44 = vld [vmem:[#allocation10 + $0x54] ss:$8 sps:$4 sm:$0xff]  }
 0x673   : > { %v1803_v62 = vpack.c.bf16 %v1799_v22, %v1796_v57  ;;  %v2987_v24 = vpop.f32.mrb[39].mxu0  ;;  %v3186_v57 = vld [vmem:[#allocation10 + $0x30] ss:$8 sps:$4 sm:$0xff]  }
 0x674   : > { %2264 = vmatpush1.bf16.msra.mxu0 %v3186_v57  ;;  %v3192_v22 = vld [vmem:[#allocation10 + $0x50] ss:$8 sps:$4 sm:$0xff]   ;;  %v3197_v24 = vld [vmem:[#allocation10 + $0x64] ss:$8 sps:$4 sm:$0xff]  }
 0x675   : > { %1805 = vrot.lane.b32.xlu0 %v1803_v62, %s3566_s25  ;;  %2265 = vmatprep.subr.bf16.mxu0 %v3191_v53  ;;  %v3195_v62 = vld [vmem:[#allocation10 + $0x60] ss:$8 sps:$4 sm:$0xff]   ;;  %v2165_v57 = vld [vmem:[%s4371_s12] sm:$0x3]  ;;  %s3465_s12 = scalar_lea.vmem %s3464_s22, 1024 }
 0x676   : > { %v2170_v53 = vrot.slane %v2165_v57, %v682_v16 }
 0x678   : > { %v1923_v6 = vpop.f32.mrb[40].mxu0  ;;  %2266 = vmatpush1.bf16.msra.mxu0 %v3189_v21  ;;  %v2174_v21 = vrot.slane %v2165_v57, %v686_v18 }
 0x679   : > { %v2998_v25 = vpop.f32.mrb[41].mxu0  ;;  %2267 = vmatprep.subr.bf16.mxu0 %v3194_v44 }
 0x67a   : > { %v1926_v27 = vpop.f32.mrb[42].mxu0  ;;  %v3198_v25 = vld [vmem:[#allocation10 + $0x70] ss:$8 sps:$4 sm:$0xff]  }
 0x67b   : > { %v1930_v1 = vpack.c.bf16 %v1926_v27, %v1923_v6  ;;  %v2999_v28 = vpop.f32.mrb[43].mxu0  ;;  %v3200_v6 = vld [vmem:[#allocation10 + $0x74] ss:$8 sps:$4 sm:$0xff]   ;;  %v3201_v27 = vld [vmem:[#allocation12 + $0x40] sm:$0xff]  }
 0x67c   : > { %2268 = vmatpush1.bf16.msra.mxu0 %v3192_v22  ;;  %v3203_v28 = vld [vmem:[#allocation12 + $0x48] sm:$0xff]   ;;  %2856 = vmatprep.subr.bf16.mxu1 %v3201_v27 }
 0x67d   : > { %1932 = vrot.lane.b32.xlu1 %v1930_v1, %s3565_s10  ;;  %2269 = vmatprep.subr.bf16.mxu0 %v3197_v24  ;;  %v3202_v1 = vld [vmem:[#allocation12] sm:$0xff]  }
 0x680   : > { %2270 = vmatpush1.bf16.msra.mxu0 %v3195_v62 }
 0x681   : > { %2271 = vmatprep.subr.bf16.mxu0 %v3200_v6 }
 0x684   : > { %2272 = vmatpush1.bf16.msra.mxu0 %v3198_v25 }
 0x69e   : > { %v1176_v20 = vpop.permute.xlu0 %1175 }
 0x69f   : > { %1179 = vst.msk [vmem:[#allocation3] sm:$0xff] %vm1178_vm3, %v1176_v20  ;;  %v3204_v20 = vld [vmem:[#allocation12 + $0x8] sm:$0xff]  }
 0x6a6   : > { %v1304_v12 = vpop.permute.xlu1 %1303 }
 0x6a7   : > { %1307 = vst.msk [vmem:[#allocation3] sm:$0xff] %vm1306_vm4, %v1304_v12 }
 0x6ae   : > { %v1432_v19 = vpop.permute.xlu1 %1431 }
 0x6af   : > { %1435 = vst.msk [vmem:[#allocation3] sm:$0xff] %vm1434_vm5, %v1432_v19 }
 0x6b6   : > { %v1936_v33 = vld [vmem:[#allocation3] sm:$0xff] }
 0x6b7   : > { %3016 = vmatprep.mubr.bf16.mxu1 %v1936_v33 }
 0x6c6   : > { %v1679_v5 = vpop.permute.xlu0 %1678 }
 0x6c7   : > { %1681 = vst.msk [vmem:[#allocation3 + $0x8] sm:$0xff] %vm1178_vm3, %v1679_v5 }
 0x6e7   : > { %v1806_v23 = vpop.permute.xlu0 %1805 }
 0x6e8   : > { %1808 = vst.msk [vmem:[#allocation3 + $0x8] sm:$0xff] %vm1306_vm4, %v1806_v23 }
 0x6ef   : > { %v1933_v8 = vpop.permute.xlu1 %1932 }
 0x6f0   : > { %1935 = vst.msk [vmem:[#allocation3 + $0x8] sm:$0xff] %vm1434_vm5, %v1933_v8 }
 0x6f7   : > { %v1937_v26 = vld [vmem:[#allocation3 + $0x8] sm:$0xff] }
 0x6f8   : > { %3017 = vmatmul.mubr.bf16.vlgmr.msra.gmra.mrb[32].mxu1 %v1937_v26 }
 0x6f9   : > { %2857 = vmatpush3.bf16.msra.mxu1 %v3202_v1 }
 0x6fa   : > { %2858 = vmatprep.subr.bf16.mxu1 %v3203_v28 }
 0x6fd   : > { %2859 = vmatpush3.bf16.msra.mxu1 %v3204_v20 }
 0x7cb   : > { %v3018_v3 = vpop.f32.mrb[32].mxu1 }
 0x7cc   : > { %v2043_v29 = vpop.f32.mrb[33].mxu1  ;;  %v2052_v43 = vadd.f32 %v3018_v3, %v2753_v37 }
 0x7cd   : > { %v2044_v40 = vadd.f32 %v2753_v37, %v2043_v29  ;;  %v3019_v30 = vpop.f32.mrb[34].mxu1 }
 0x7ce   : > { %v2046_v46 = vpop.f32.mrb[35].mxu1  ;;  %v4209_v49 = vadd.f32 %v3315_v14, %v2052_v43  ;;  %v2055_v34 = vadd.f32 %v3019_v30, %v2753_v37  ;;  %v2762_v43 = vld [vmem:[%s4369_s14] ss:$0 sm:$0xff]  ;;  %s4374_s14 = sld [smem:[#allocation27_spill]] }
 0x7cf   : > { %v4202_v47 = vadd.f32 %v3313_v32, %v2044_v40  ;;  %v2047_v59 = vadd.f32 %v2753_v37, %v2046_v46 }
 0x7d0   : > { %v4214_v50 = vadd.f32 %v3316_v63, %v2055_v34  ;;  %v2763_v63 = vld [vmem:[%s4370_s20] ss:$0 sm:$0xff]  ;;  %s3459_s20 = scalar_lea.vmem %s4270_s19, 512 }
 0x7d1   : > { %v4205_v35 = vadd.f32 %v3314_v48, %v2047_v59  ;;  %2064 = vadd.xlane.f32.xlu0 %v4202_v47  ;;  %p3460_p8 = scmp.ne.s32.totalorder %s4270_s19, %s3459_s20  ;;  %p3467_p7 = scmp.lt.s32.totalorder %s3465_s12, %s3459_s20 }
 0x7d3   : > { %2066 = vadd.xlane.f32.xlu1 %v4205_v35  ;;  %p3461_p6 = pnand %p3460_p8, %p3813_p5  ;;  %p3468_p9 = por %p3467_p7, %p3466_p3 }
 0x7d4   : > { %s4268_s16 = scalar_lea.hbm %s4374_s14, %s2803_s1 }
 0x7d5   : > { %2068 = vadd.xlane.f32.xlu0 %v4209_v49  ;;  %p3462_p10 = pneg %p3461_p6 }
 0x7d7   : > { %p3469_p0 = pnand %p3468_p9, %p3462_p10 }
 0x7d9   : > { %2070 = vadd.xlane.f32.xlu0 %v4214_v50 }
 0x85e   : > { %v2065_v58 = vpop.xlane.xlu0 %2064 }
 0x85f   : > { %v2072_v60 = vmul.f32 0.0078125, %v2065_v58 }
 0x860   : > { %v2067_v42 = vpop.xlane.xlu1 %2066 }
 0x861   : > { %v4218_v61 = vsub.f32 %v4202_v47, %v2072_v60  ;;  %v2073_v31 = vmul.f32 0.0078125, %v2067_v42 }
 0x862   : > { %v2069_v36 = vpop.xlane.xlu0 %2068 }
 0x863   : > { %v4221_v0 = vsub.f32 %v4205_v35, %v2073_v31  ;;  %v2074_v2 = vmul.f32 0.0078125, %v2069_v36  ;;  %v2080_v4 = vmul.f32 %v4218_v61, %v4218_v61 }
 0x865   : > { %v4226_v52 = vsub.f32 %v4209_v49, %v2074_v2  ;;  %2084 = vadd.xlane.f32.xlu0 %v2080_v4  ;;  %v2081_v7 = vmul.f32 %v4221_v0, %v4221_v0  ;;  %v3205_v4 = vld [vmem:[#allocation12 + $0x50] sm:$0xff]  }
 0x866   : > { %v2071_v45 = vpop.xlane.xlu0 %2070  ;;  %2860 = vmatprep.subr.bf16.mxu1 %v3205_v4 }
 0x867   : > { %v2075_v41 = vmul.f32 0.0078125, %v2071_v45  ;;  %2086 = vadd.xlane.f32.xlu1 %v2081_v7  ;;  %v2082_v9 = vmul.f32 %v4226_v52, %v4226_v52  ;;  %v3206_v7 = vld [vmem:[#allocation12 + $0x10] sm:$0xff]   ;;  %v3207_v45 = vld [vmem:[#allocation12 + $0x58] sm:$0xff]  }
 0x868   : > { %2861 = vmatpush3.bf16.msra.mxu1 %v3206_v7 }
 0x869   : > { %v4233_v56 = vsub.f32 %v4214_v50, %v2075_v41  ;;  %2088 = vadd.xlane.f32.xlu0 %v2082_v9  ;;  %v3208_v41 = vld [vmem:[#allocation12 + $0x18] sm:$0xff]   ;;  %2862 = vmatprep.subr.bf16.mxu1 %v3207_v45  ;;  %v3210_v9 = vld [vmem:[#allocation12 + $0x20] sm:$0xff]  }
 0x86b   : > { %v2083_v10 = vmul.f32 %v4233_v56, %v4233_v56 }
 0x86c   : > { %2863 = vmatpush3.bf16.msra.mxu1 %v3208_v41 }
 0x86d   : > { %2090 = vadd.xlane.f32.xlu1 %v2083_v10  ;;  %v3212_v10 = vld [vmem:[#allocation12 + $0x28] sm:$0xff]  }
 0x8f2   : > { %v2085_v12 = vpop.xlane.xlu0 %2084 }
 0x8f3   : > { %v2092_v19 = vmul.f32 0.0078125, %v2085_v12 }
 0x8f4   : > { %v2087_v33 = vpop.xlane.xlu1 %2086 }
 0x8f5   : > { %v2096_v5 = vadd.f32 1e-05, %v2092_v19  ;;  %v2093_v23 = vmul.f32 0.0078125, %v2087_v33 }
 0x8f6   : > { %v2089_v8 = vpop.xlane.xlu0 %2088 }
 0x8f7   : > { %3289 = vrsqrt.f32 %v2096_v5  ;;  %v2097_v26 = vadd.f32 1e-05, %v2093_v23  ;;  %v2094_v37 = vmul.f32 0.0078125, %v2089_v8 }
 0x8f9   : > { %3291 = vrsqrt.f32 %v2097_v26  ;;  %v2098_v3 = vadd.f32 1e-05, %v2094_v37 }
 0x8fa   : > { %v2091_v29 = vpop.xlane.xlu1 %2090 }
 0x8fb   : > { %3293 = vrsqrt.f32 %v2098_v3  ;;  %v2095_v40 = vmul.f32 0.0078125, %v2091_v29 }
 0x8fd   : > { %v2099_v30 = vadd.f32 1e-05, %v2095_v40 }
 0x8ff   : > { %3295 = vrsqrt.f32 %v2099_v30 }
 0x901   : > { %v3290_v46 = vpop.eup %3289 }
 0x902   : > { %v2104_v32 = vmul.f32 %v3290_v46, %v4218_v61 }
 0x903   : > { %v3292_v59 = vpop.eup %3291 }
 0x904   : > { %v2105_v48 = vmul.f32 %v3292_v59, %v4221_v0  ;;  %v2114_v14 = vmul.f32 %v2762_v43, %v2104_v32 }
 0x905   : > { %v3294_v34 = vpop.eup %3293 }
 0x906   : > { %v2115_v51 = vmul.f32 %v2762_v43, %v2105_v48  ;;  %v2124_v54 = vadd.f32 %v2763_v63, %v2114_v14  ;;  %v2106_v38 = vmul.f32 %v3294_v34, %v4226_v52  ;;  %v3209_v52 = vld [vmem:[#allocation12 + $0x60] sm:$0xff]  }
 0x907   : > { %2864 = vmatprep.subr.bf16.mxu1 %v3209_v52 }
 0x908   : > { %v2125_v55 = vadd.f32 %v2763_v63, %v2115_v51  ;;  %v2116_v61 = vmul.f32 %v2762_v43, %v2106_v38  ;;  %2865 = vmatpush3.bf16.msra.mxu1 %v3210_v9 }
 0x909   : > { %v3296_v58 = vpop.eup %3295 }
 0x90a   : > { %v2143_v60 = vpack.c.bf16 %v2125_v55, %v2124_v54  ;;  %v2107_v42 = vmul.f32 %v3296_v58, %v4233_v56  ;;  %v2126_v0 = vadd.f32 %v2763_v63, %v2116_v61  ;;  %v3211_v56 = vld [vmem:[#allocation12 + $0x68] sm:$0xff]  }
 0x90b   : > { %2866 = vmatprep.subr.bf16.mxu1 %v3211_v56 }
 0x90c   : > { %2290 = vmatmul.mubr.bf16.vlgmr.msra.gmra.mrb[44].mxu0 %v2143_v60  ;;  %v2117_v31 = vmul.f32 %v2762_v43, %v2107_v42  ;;  %2867 = vmatpush3.bf16.msra.mxu1 %v3212_v10 }
 0x90d   : > { %2299 = vmatprep.mubr.bf16.mxu0 %v3562_v39  ;;  %v3213_v39 = vld [vmem:[#allocation12 + $0x70] sm:$0xff]  }
 0x90e   : > { %v2127_v36 = vadd.f32 %v2763_v63, %v2117_v31  ;;  %2868 = vmatprep.subr.bf16.mxu1 %v3213_v39 }
 0x910   : > { %v2144_v2 = vpack.c.bf16 %v2127_v36, %v2126_v0  ;;  %2869 = vmatpush3.bf16.msra.mxu1 %v3214_v11 }
 0x911   : > { %2870 = vmatprep.subr.bf16.mxu1 %v3215_v13 }
 0x914   : > { %2300 = vmatmul.mubr.bf16.gmra.mrb[48].mxu0 %v2144_v2  ;;  %2871 = vmatpush3.bf16.msra.mxu1 %v3216_v17 }
 0x9df   : > { %v2291_v44 = vpop.f32.mrb[44].mxu0 }
 0x9e0   : > { %v2292_v22 = vadd.f32 %v2291_v44, %v2170_v53  ;;  %v2293_v62 = vpop.f32.mrb[45].mxu0  ;;  %v2764_v44 = vld [vmem:[%s4372_s21] ss:$0 sm:$0xff] }
 0x9e1   : > { %v2294_v24 = vadd.f32 %v2293_v62, %v2174_v21  ;;  %v2295_v6 = vpop.f32.mrb[46].mxu0 }
 0x9e2   : > { %v2318_v25 = vmul.f32 0.70710677, %v2292_v22  ;;  %v2296_v27 = vadd.f32 %v2295_v6, %v2170_v53  ;;  %v2297_v1 = vpop.f32.mrb[47].mxu0  ;;  %v2310_v14 = vmul.f32 0.5, %v2292_v22 }
 0x9e3   : > { %v2319_v28 = vmul.f32 0.70710677, %v2294_v24  ;;  %v2298_v20 = vadd.f32 %v2297_v1, %v2174_v21  ;;  %v2311_v51 = vmul.f32 0.5, %v2294_v24  ;;  %v2135_v24 = vadd.f32 %v2764_v44, %v4202_v47 }
 0x9e4   : > { %3297 = verf.f32 %v2318_v25  ;;  %v2320_v12 = vmul.f32 0.70710677, %v2296_v27  ;;  %v2312_v34 = vmul.f32 0.5, %v2296_v27  ;;  %v2136_v1 = vadd.f32 %v2764_v44, %v4205_v35 }
 0x9e5   : > { %3299 = verf.f32 %v2319_v28  ;;  %v2321_v19 = vmul.f32 0.70710677, %v2298_v20  ;;  %v2313_v54 = vmul.f32 0.5, %v2298_v20  ;;  %v2138_v35 = vadd.f32 %v2764_v44, %v4214_v50 }
 0x9e6   : > { %3301 = verf.f32 %v2320_v12 }
 0x9e7   : > { %3303 = verf.f32 %v2321_v19  ;;  %v2301_v16 = vpop.f32.mrb[48].mxu0 }
 0x9e8   : > { %v2302_v33 = vadd.f32 %v2301_v16, %v2170_v53  ;;  %v2303_v15 = vpop.f32.mrb[49].mxu0 }
 0x9e9   : > { %v2304_v18 = vadd.f32 %v2303_v15, %v2174_v21  ;;  %v2305_v5 = vpop.f32.mrb[50].mxu0 }
 0x9ea   : > { %v2322_v23 = vmul.f32 0.70710677, %v2302_v33  ;;  %v2306_v8 = vadd.f32 %v2305_v5, %v2170_v53  ;;  %v2307_v26 = vpop.f32.mrb[51].mxu0  ;;  %v2314_v41 = vmul.f32 0.5, %v2302_v33  ;;  %v2137_v33 = vadd.f32 %v2764_v44, %v4209_v49 }
 0x9eb   : > { %v2323_v37 = vmul.f32 0.70710677, %v2304_v18  ;;  %v2308_v3 = vadd.f32 %v2307_v26, %v2174_v21  ;;  %v2315_v56 = vmul.f32 0.5, %v2304_v18 }
 0x9ec   : > { %3305 = verf.f32 %v2322_v23  ;;  %v2324_v29 = vmul.f32 0.70710677, %v2306_v8  ;;  %v2316_v52 = vmul.f32 0.5, %v2306_v8 }
 0x9ed   : > { %3307 = verf.f32 %v2323_v37  ;;  %v2325_v40 = vmul.f32 0.70710677, %v2308_v3  ;;  %v2317_v10 = vmul.f32 0.5, %v2308_v3 }
 0x9ee   : > { %v3298_v30 = vpop.eup %3297  ;;  %3309 = verf.f32 %v2324_v29 }
 0x9ef   : > { %v3300_v46 = vpop.eup %3299  ;;  %v2334_v43 = vadd.f32 1.0, %v3298_v30  ;;  %3311 = verf.f32 %v2325_v40 }
 0x9f0   : > { %v3302_v32 = vpop.eup %3301  ;;  %v2335_v59 = vadd.f32 1.0, %v3300_v46 }
 0x9f1   : > { %v3304_v48 = vpop.eup %3303  ;;  %v2336_v63 = vadd.f32 1.0, %v3302_v32  ;;  %v2342_v38 = vmul.f32 %v2334_v43, %v2310_v14 }
 0x9f2   : > { %v2337_v55 = vadd.f32 1.0, %v3304_v48  ;;  %v2343_v60 = vmul.f32 %v2335_v59, %v2311_v51 }
 0x9f3   : > { %v2344_v58 = vmul.f32 %v2336_v63, %v2312_v34 }
 0x9f4   : > { %v2345_v42 = vmul.f32 %v2337_v55, %v2313_v54 }
 0x9f5   : > { %v2354_v61 = vpack.c.bf16 %v2344_v58, %v2342_v38 }
 0x9f6   : > { %v3306_v31 = vpop.eup %3305  ;;  %v2355_v36 = vpack.c.bf16 %v2345_v42, %v2343_v60 }
 0x9f7   : > { %v3308_v0 = vpop.eup %3307  ;;  %v2338_v2 = vadd.f32 1.0, %v3306_v31 }
 0x9f8   : > { %v3310_v4 = vpop.eup %3309  ;;  %v2339_v7 = vadd.f32 1.0, %v3308_v0  ;;  %2518 = vmatprep.mubr.bf16.mxu1 %v2355_v36 }
 0x9f9   : > { %v3312_v45 = vpop.eup %3311  ;;  %v2340_v9 = vadd.f32 1.0, %v3310_v4  ;;  %2519 = vmatmul.mubr.bf16.vlgmr.msra.gmra.mrb[36].mxu1 %v2354_v61  ;;  %v2346_v11 = vmul.f32 %v2338_v2, %v2314_v41 }
 0x9fa   : > { %v2341_v39 = vadd.f32 1.0, %v3312_v45  ;;  %v2347_v17 = vmul.f32 %v2339_v7, %v2315_v56 }
 0x9fb   : > { %v2348_v13 = vmul.f32 %v2340_v9, %v2316_v52 }
 0x9fc   : > { %v2349_v57 = vmul.f32 %v2341_v39, %v2317_v10 }
 0x9fd   : > { %v2356_v53 = vpack.c.bf16 %v2348_v13, %v2346_v11 }
 0x9fe   : > { %v2357_v21 = vpack.c.bf16 %v2349_v57, %v2347_v17 }
 0xa00   : > { %2526 = vmatprep.mubr.bf16.mxu1 %v2357_v21 }
 0xa01   : > { %2527 = vmatmul.mubr.bf16.gmra.mrb[40].mxu1 %v2356_v53 }
 0xacc   : > { %v2872_v22 = vpop.f32.mrb[36].mxu1 }
 0xacd   : > { %v2873_v62 = vpop.f32.mrb[37].mxu1 }
 0xace   : > { %v2874_v6 = vadd.f32 %v2873_v62, %v2872_v22  ;;  %v2875_v25 = vpop.f32.mrb[38].mxu1 }
 0xacf   : > { %v2876_v27 = vpop.f32.mrb[39].mxu1 }
 0xad0   : > { %v2535_v28 = vadd.f32 %v2874_v6, %v2135_v24  ;;  %v2877_v20 = vadd.f32 %v2876_v27, %v2875_v25 }
 0xad2   : > { %2539 = vst [vmem:[%s558_s17] sm:$0xff] %v2535_v28  ;;  %v2536_v12 = vadd.f32 %v2877_v20, %v2136_v1 }
 0xad4   : > { %2540 = vst [vmem:[%s558_s17 + $0x8] sm:$0xff] %v2536_v12  ;;  %v2878_v19 = vpop.f32.mrb[40].mxu1 }
 0xad5   : > { %v2879_v16 = vpop.f32.mrb[41].mxu1 }
 0xad6   : > { %v2880_v15 = vadd.f32 %v2879_v16, %v2878_v19  ;;  %v2881_v47 = vpop.f32.mrb[42].mxu1 }
 0xad7   : > { %v2882_v18 = vpop.f32.mrb[43].mxu1 }
 0xad8   : > { %v2537_v5 = vadd.f32 %v2880_v15, %v2137_v33  ;;  %v2883_v23 = vadd.f32 %v2882_v18, %v2881_v47 }
 0xada   : > { %2541 = vst [vmem:[%s558_s17 + $0x10] sm:$0xff] %v2537_v5  ;;  %v2538_v49 = vadd.f32 %v2883_v23, %v2138_v35 }
 0xadc   : > { %2542 = vst [vmem:[%s558_s17 + $0x18] sm:$0xff] %v2538_v49 }
 0xadd   : > { %3472 = shalt.err (!%p3469_p0)
}
 0xade   : > { %s3473_s10 = scalar_lea.hbm %s4268_s16, 512  ;;  %s3477_s24 = scalar_lea.hbm %s4374_s14, 1024 }
 0xadf   : > { %p3474_p4 = scmp.ne.s32.totalorder %s4268_s16, %s3473_s10  ;;  %p3478_p12 = scmp.lt.u32.totalorder %s4268_s16, %s4374_s14 }
 0xae0   : > { %p3479_p1 = scmp.lt.u32.totalorder %s3477_s24, %s3473_s10  ;;  %p3481_p8 = scmp.lt.u32.totalorder %s3473_s10, %s4268_s16 }
 0xae1   : > { %p3475_p13 = pnand %p3474_p4, %p3813_p5 }
 0xae2   : > { %p3480_p11 = por %p3479_p1, %p3478_p12 }
 0xae3   : > { %p3476_p2 = pneg %p3475_p13 }
 0xae4   : > { %p3482_p6 = por %p3481_p8, %p3480_p11 }
 0xae6   : > { %p3483_p10 = pnand %p3482_p6, %p3476_p2 }
 0xae8   : > { %3486 = shalt.err (!%p3483_p10)
}
 0xae9   : > { %s3569_s8 = smov 128   ;;  %s3570_s4 = smov 8  }
 0xaea   : > { %3038 = dma.vmem_to_hbm [thread:$0]  (%p3813_p5), %s4270_s19, 512, %s4268_s16, %s2544_s18, %s3569_s8, %s3569_s8, %s3570_s4  }
 0xaeb PF: > { %s4375_s20 = sld [smem:[#allocation18_spill]]  ;;  %s4376_s13 = sld [smem:[#allocation20_spill]] }
 0xaec   : > { %p4378_p7 = scmp.ge.s32.totalorder %s3549_s30, 2 }
 0xaf1   : > { %s2572_s22 = sand.u32 1, %s4375_s20   ;;  %p4377_p3 = scmp.ne.s32.totalorder %s4376_s13, 0 }
 0xaf2   : > { %s2573_s12 = scalar_lea.sflag [#allocation6], %s2572_s22 }
 0xaf3   : > { %p3058_p9 = pnand %p4378_p7, %p4377_p3 }
 0xaf5   : > { %3524 = dma.done.wait (!%p3058_p9), %s2573_s12, 512  }
 0xaf6   : > { %3526 = vsyncadd (!%p3058_p9), %s2573_s12, 4294966784  ;;  %s31_s30 = sadd.s32 1, %s3549_s30   ;;  %s4379_s23 = smov %s4386_s28 }
 0xaf7   : > { %p28_p0 = scmp.ge.s32.totalorder %s31_s30, 4   ;;  %s4380_s25 = smov %s3533_s26 }
 0xaf8   : > { %s4381_s26 = smov %s3537_s27  ;;  %s4382_s27 = smov %s3822_s15 }
 0xaf9   : > { %s4383_s28 = smov %s3545_s29  ;;  %s4384_s29 = smov %s4379_s23 }
 0xafa   :  { %30 = sbr.rel (!%p28_p0) target bundleno = 16 (0x10), region = 142 }
 0xb01   :  { %2578 = vsyncpa [#allocation5], 1 }
 0xb02   :  { %2580 = vsyncpa [#allocation5 + $0x1], 1 }
 0xb03   :  { %2581 = vsyncpa [#allocation8], 1 }
 0xb04   :  { %2582 = vsyncpa [#allocation11], 1 }
 0xb05   :  { %2583 = vsyncpa [#allocation6], 1 }
 0xb06   :  { %2585 = vsyncpa [#allocation6 + $0x1], 1 }

</bundles_post_ra>
